<compile_context>
chip_gen: v6e
topology: v6e:2x2x1
jax: 0.10.0
libtpu: 0.0.40
codegen_flags: <defaults>
</compile_context>

<pallas_src>
import math

import jax
import jax.numpy as jnp
from jax import lax
from jax.experimental import pallas as pl
from jax.experimental.pallas import tpu as pltpu

PI = 1.0
SIGMA_1 = math.exp(-0.0)   # matches torch.FloatTensor([exp(-0)])
SIGMA_2 = math.exp(-6.0)   # matches torch.FloatTensor([exp(-6)])
LOG_SQRT_2PI = 0.5 * math.log(2.0 * math.pi)

# Padding value for rho: softplus(_RHO_PAD) == 1  =>  log(sigma)=0 on padded elements.
_RHO_PAD = math.log(math.e - 1.0)


def _round_up(x, m):
    return (x + m - 1) // m * m


def _softplus(x):
    # Numerically stable log1p(exp(x)); the naive form overflows for x >~ 88.
    return jnp.maximum(x, 0.0) + jnp.log1p(jnp.exp(-jnp.abs(x)))


def _mixture_log_prior_sum(v, n_valid, valid_mask):
    """Sum over a tile of log(PI*N(v;0,S1) + (1-PI)*N(v;0,S2)).  Padded v must be 0.
    Returns a (1, 1) array."""
    if PI == 1.0:
        # Closed form: removes both exp() and the outer log() per element.
        c = -math.log(SIGMA_1) - LOG_SQRT_2PI
        return n_valid * c - jnp.sum(v * v, keepdims=True) * (0.5 / (SIGMA_1 * SIGMA_1))
    # General PI: log-space mixture (no exp/log underflow round trip), masked padding.
    c1 = math.log(PI) - math.log(SIGMA_1) - LOG_SQRT_2PI
    c2 = math.log(1.0 - PI) - math.log(SIGMA_2) - LOG_SQRT_2PI
    lp1 = c1 - v * v * (0.5 / (SIGMA_1 * SIGMA_1))
    lp2 = c2 - v * v * (0.5 / (SIGMA_2 * SIGMA_2))
    per = jnp.logaddexp(lp1, lp2)
    return jnp.sum(jnp.where(valid_mask, per, 0.0), keepdims=True)


def _posterior_log_prob_sum(sigma, eps, n_valid):
    """Sum of log N(w; mu, sigma) using (w - mu) == sigma * eps.
    Padded elements have sigma=1, eps=0, so only the constant term needs n_valid.
    Returns a (1, 1) array."""
    return (-n_valid * LOG_SQRT_2PI
            - jnp.sum(jnp.log(sigma), keepdims=True)
            - 0.5 * jnp.sum(eps * eps, keepdims=True))


def _make_fused_kernel(in_true, out_true, tk, tn, use_bf16_mxu):
    """Fused kernel: sample W tile (native (out,in) layout), accumulate log-prob
    partials per out-tile, transpose the tile in-kernel, and run the MXU matmul."""

    def kernel(x_ref, wmu_ref, wrho_ref, weps_ref, bmu_ref, brho_ref, beps_ref,
               y_ref, lp_ref, lvp_ref, acc_ref):
        j = pl.program_id(0)   # tile index along out_features (parallel)
        k = pl.program_id(1)   # tile index along in_features  (reduction)

        # ---- sample this weight tile in the native (out, in) layout ------------
        mu = wmu_ref[...]
        rho = wrho_ref[...]
        eps = weps_ref[...]
        sigma = _softplus(rho)
        w = mu + sigma * eps                           # (tn, tk)

        # number of non-padded elements in this tile (pure scalar arithmetic)
        rows_valid = jnp.minimum(out_true - j * tn, tn).astype(jnp.float32)
        cols_valid = jnp.minimum(in_true - k * tk, tk).astype(jnp.float32)
        n_valid = rows_valid * cols_valid

        if PI == 1.0:
            w_mask = None
        else:
            row_ids = j * tn + lax.broadcasted_iota(jnp.int32, (tn, tk), 0)
            col_ids = k * tk + lax.broadcasted_iota(jnp.int32, (tn, tk), 1)
            w_mask = (row_ids < out_true) & (col_ids < in_true)

        prior_tile = _mixture_log_prior_sum(w, n_valid, w_mask)
        post_tile = _posterior_log_prob_sum(sigma, eps, n_valid)

        # ---- bias for this out-tile (tiny (1, tn) element-wise work) -----------
        beps = beps_ref[...]
        bsig = _softplus(brho_ref[...])
        bsam = bmu_ref[...] + bsig * beps              # (1, tn), f32

        # k == 0: zero the matmul accumulator and seed the per-out-tile log-prob
        # partials with this tile's bias contribution (each bias column is counted
        # exactly once because each j owns its own partial output block).
        @pl.when(k == 0)
        def _init():
            acc_ref[...] = jnp.zeros_like(acc_ref)
            nb = jnp.minimum(out_true - j * tn, tn).astype(jnp.float32)
            if PI == 1.0:
                b_mask = None
            else:
                col_ids = j * tn + lax.broadcasted_iota(jnp.int32, (1, tn), 1)
                b_mask = col_ids < out_true
            lp_ref[...] = _mixture_log_prior_sum(bsam, nb, b_mask)
            lvp_ref[...] = _posterior_log_prob_sum(bsig, beps, nb)

        # Accumulate this weight tile's contribution into the resident partials.
        lp_ref[...] += prior_tile
        lvp_ref[...] += post_tile

        # ---- matmul: transpose the sampled tile on the XLU so the MXU gets a
        #      clean (K, N) RHS and the y store stays lane-dense along N ---------
        w_kn = w.T                                     # (tk, tn)
        x = x_ref[...]
        if use_bf16_mxu:
            w_kn = w_kn.astype(jnp.bfloat16)           # x is already bf16 from wrapper
        acc_ref[...] += jnp.dot(x, w_kn, preferred_element_type=jnp.float32)

        @pl.when(k == pl.num_programs(1) - 1)
        def _finish():
            y_ref[...] = (acc_ref[...] + bsam).astype(y_ref.dtype)

    return kernel


def bayesian_linear_forward(x, weight_mu, weight_rho, eps_w, bias_mu, bias_rho, eps_b,
                            *, use_bf16_mxu=False,
                            tile_k=1024, tile_n=512,
                            vmem_budget_bytes=40 * 1024 * 1024,
                            vmem_limit_bytes=48 * 1024 * 1024):
    """Sample-path forward of BayesianLinear.

    Returns (y, log_prior, log_variational_posterior).
    """
    x = x.astype(jnp.float32)
    batch, in_features = x.shape
    out_features = weight_mu.shape[0]

    # Batch is kept whole in VMEM (small-batch, HBM-bound regime); feature tiles are
    # multiples of 128 and auto-shrink to stay under the scoped-VMEM budget.
    bp = _round_up(batch, 8)
    tk = min(_round_up(in_features, 128), tile_k)
    tn = min(_round_up(out_features, 128), tile_n)
    x_bytes_per_el = 2 if use_bf16_mxu else 4

    def footprint(tk_, tn_):
        return (2 * bp * tk_ * x_bytes_per_el     # x blocks (double-buffered)
                + 2 * 3 * tn_ * tk_ * 4           # mu / rho / eps blocks
                + 2 * bp * tn_ * 4                # y blocks
                + bp * tn_ * 4                    # f32 accumulator scratch
                + 2 * 3 * tn_ * 4)                # bias param blocks

    while footprint(tk, tn) > vmem_budget_bytes and max(tk, tn) > 128:
        if tk >= tn and tk > 128:
            tk = max(128, (tk // 2) // 128 * 128)
        else:
            tn = max(128, (tn // 2) // 128 * 128)

    # v7x megacore: make sure the parallel out-features axis has >= 2 blocks.
    if tn > 128 and _round_up(out_features, tn) // tn < 2:
        tn = max(128, (tn // 2) // 128 * 128)

    kp = _round_up(in_features, tk)
    np_ = _round_up(out_features, tn)
    gj, gk = np_ // tn, kp // tk
    vmem_limit_bytes = min(max(vmem_limit_bytes, int(footprint(tk, tn) * 1.2)),
                           128 * 1024 * 1024)

    def pad2(a, rows, cols, val, dtype=jnp.float32):
        a = a.astype(dtype)
        r, c = a.shape
        if r == rows and c == cols:
            return a
        return jnp.pad(a, ((0, rows - r), (0, cols - c)), constant_values=val)

    # Weight-shaped params stay in the NATIVE (out_features, in_features) layout —
    # no wrapper-side transposes; sampled tiles are transposed in-kernel (XLU).
    wmu_p = pad2(weight_mu, np_, kp, 0.0)
    wrho_p = pad2(weight_rho, np_, kp, _RHO_PAD)
    weps_p = pad2(eps_w, np_, kp, 0.0)

    bmu_p = pad2(bias_mu.reshape(1, out_features), 1, np_, 0.0)
    brho_p = pad2(bias_rho.reshape(1, out_features), 1, np_, _RHO_PAD)
    beps_p = pad2(eps_b.reshape(1, out_features), 1, np_, 0.0)

    xp = pad2(x, bp, kp, 0.0,
              dtype=jnp.bfloat16 if use_bf16_mxu else jnp.float32)

    kernel = _make_fused_kernel(in_features, out_features, tk, tn, use_bf16_mxu)

    y_padded, lp_part, lvp_part = pl.pallas_call(
        kernel,
        out_shape=(
            jax.ShapeDtypeStruct((bp, np_), jnp.float32),     # y (padded)
            jax.ShapeDtypeStruct((gj, 1, 1), jnp.float32),    # log_prior partials
            jax.ShapeDtypeStruct((gj, 1, 1), jnp.float32),    # log_var_post partials
        ),
        grid_spec=pltpu.PrefetchScalarGridSpec(
            num_scalar_prefetch=0,
            grid=(gj, gk),
            in_specs=[
                pl.BlockSpec((bp, tk), lambda j, k: (0, k)),   # x
                pl.BlockSpec((tn, tk), lambda j, k: (j, k)),   # weight_mu
                pl.BlockSpec((tn, tk), lambda j, k: (j, k)),   # weight_rho
                pl.BlockSpec((tn, tk), lambda j, k: (j, k)),   # eps_w
                pl.BlockSpec((1, tn), lambda j, k: (0, j)),    # bias_mu
                pl.BlockSpec((1, tn), lambda j, k: (0, j)),    # bias_rho
                pl.BlockSpec((1, tn), lambda j, k: (0, j)),    # eps_b
            ],
            out_specs=[
                pl.BlockSpec((bp, tn), lambda j, k: (0, j)),          # y
                pl.BlockSpec((None, 1, 1), lambda j, k: (j, 0, 0)),   # lp partial
                pl.BlockSpec((None, 1, 1), lambda j, k: (j, 0, 0)),   # lvp partial
            ],
            scratch_shapes=[pltpu.VMEM((bp, tn), jnp.float32)],
        ),
        compiler_params=pltpu.CompilerParams(
            # per-out-tile partials + per-j resident accumulators -> j can be parallel
            dimension_semantics=("parallel", "arbitrary"),
            vmem_limit_bytes=vmem_limit_bytes,
        ),
        cost_estimate=pl.CostEstimate(
            flops=int(2 * bp * np_ * kp + 10 * np_ * kp),
            transcendentals=int(2 * np_ * kp),
            bytes_accessed=int(3 * np_ * kp * 4
                               + gj * bp * kp * x_bytes_per_el
                               + bp * np_ * 4
                               + 6 * np_ * 4),
        ),
    )(xp, wmu_p, wrho_p, weps_p, bmu_p, brho_p, beps_p)

    y = y_padded[:batch, :out_features]
    log_prior = jnp.sum(lp_part)
    log_variational_posterior = jnp.sum(lvp_part)
    return y, log_prior, log_variational_posterior


if __name__ == "__main__":
    # Small shapes consistent with BayesianLinear(in_features, out_features)
    batch, in_features, out_features = 8, 32, 16

    key = jax.random.PRNGKey(0)
    k_x, k_wmu, k_wrho, k_bmu, k_brho, k_ew, k_eb = jax.random.split(key, 7)

    x = jax.random.normal(k_x, (batch, in_features), dtype=jnp.float32)
    weight_mu = jax.random.uniform(k_wmu, (out_features, in_features),
                                   minval=-0.2, maxval=0.2, dtype=jnp.float32)
    weight_rho = jax.random.uniform(k_wrho, (out_features, in_features),
                                    minval=-5.0, maxval=-4.0, dtype=jnp.float32)
    bias_mu = jax.random.uniform(k_bmu, (out_features,),
                                 minval=-0.2, maxval=0.2, dtype=jnp.float32)
    bias_rho = jax.random.uniform(k_brho, (out_features,),
                                  minval=-5.0, maxval=-4.0, dtype=jnp.float32)
    # Reparameterization noise (torch.distributions.Normal(0,1).sample(...)) as input
    eps_w = jax.random.normal(k_ew, (out_features, in_features), dtype=jnp.float32)
    eps_b = jax.random.normal(k_eb, (out_features,), dtype=jnp.float32)

    y, log_prior, log_var_post = bayesian_linear_forward(
        x, weight_mu, weight_rho, eps_w, bias_mu, bias_rho, eps_b)
    jax.block_until_ready((y, log_prior, log_var_post))

    # ---------------- pure-JAX reference check ----------------
    w_sigma = jnp.log1p(jnp.exp(weight_rho))
    b_sigma = jnp.log1p(jnp.exp(bias_rho))
    w = weight_mu + w_sigma * eps_w
    b = bias_mu + b_sigma * eps_b
    y_ref = x @ w.T + b
    assert jnp.allclose(y, y_ref, atol=1e-4, rtol=1e-4), "linear output mismatch"

    def mixture_logprob_ref(v):
        lp1 = -math.log(SIGMA_1) - LOG_SQRT_2PI - v ** 2 / (2 * SIGMA_1 ** 2)
        lp2 = -math.log(SIGMA_2) - LOG_SQRT_2PI - v ** 2 / (2 * SIGMA_2 ** 2)
        return jnp.sum(jnp.log(PI * jnp.exp(lp1) + (1 - PI) * jnp.exp(lp2)))

    lp_ref = mixture_logprob_ref(w) + mixture_logprob_ref(b)
    lvp_ref = (jnp.sum(-LOG_SQRT_2PI - jnp.log(w_sigma)
                       - (w - weight_mu) ** 2 / (2 * w_sigma ** 2))
               + jnp.sum(-LOG_SQRT_2PI - jnp.log(b_sigma)
                         - (b - bias_mu) ** 2 / (2 * b_sigma ** 2)))
    assert jnp.allclose(log_prior, lp_ref, atol=5e-2, rtol=1e-4), "log_prior mismatch"
    assert jnp.allclose(log_var_post, lvp_ref, atol=1e-2, rtol=1e-4), "log_var_post mismatch"

    print("KERNEL_OK")
</pallas_src>

<mosaic_0001>
module attributes {stable_mosaic.version = 11 : i64} {
  func.func @kernel(%arg0: i32, %arg1: i32, %arg2: memref<8x128xf32, #tpu.memory_space<vmem>>, %arg3: memref<128x128xf32, #tpu.memory_space<vmem>>, %arg4: memref<128x128xf32, #tpu.memory_space<vmem>>, %arg5: memref<128x128xf32, #tpu.memory_space<vmem>>, %arg6: memref<1x128xf32, #tpu.memory_space<vmem>>, %arg7: memref<1x128xf32, #tpu.memory_space<vmem>>, %arg8: memref<1x128xf32, #tpu.memory_space<vmem>>, %arg9: memref<8x128xf32, #tpu.memory_space<vmem>>, %arg10: memref<1x1x1xf32, #tpu.memory_space<vmem>>, %arg11: memref<1x1x1xf32, #tpu.memory_space<vmem>>, %arg12: memref<8x128xf32, #tpu.memory_space<vmem>>) attributes {dimension_semantics = [#tpu.dimension_semantics<parallel>, #tpu.dimension_semantics<arbitrary>], iteration_bounds = array<i64: 1, 1>, scalar_prefetch = 0 : i64, scratch_operands = 1 : i64, tpu.core_type = #tpu.core_type<tc>, window_params = [{transform_indices = @transform_0, window_bounds = array<i64: 8, 128>}, {transform_indices = @transform_1, window_bounds = array<i64: 128, 128>}, {transform_indices = @transform_2, window_bounds = array<i64: 128, 128>}, {transform_indices = @transform_3, window_bounds = array<i64: 128, 128>}, {transform_indices = @transform_4, window_bounds = array<i64: 1, 128>}, {transform_indices = @transform_5, window_bounds = array<i64: 1, 128>}, {transform_indices = @transform_6, window_bounds = array<i64: 1, 128>}, {transform_indices = @transform_7, window_bounds = array<i64: 8, 128>}, {transform_indices = @transform_8, window_bounds = array<i64: 1, 1, 1>}, {transform_indices = @transform_9, window_bounds = array<i64: 1, 1, 1>}]} {
    %c0 = arith.constant 0 : index
    %c0_0 = arith.constant 0 : index
    %0 = vector.load %arg3[%c0, %c0_0] : memref<128x128xf32, #tpu.memory_space<vmem>>, vector<128x128xf32>
    %c0_1 = arith.constant 0 : index
    %c0_2 = arith.constant 0 : index
    %1 = vector.load %arg4[%c0_1, %c0_2] : memref<128x128xf32, #tpu.memory_space<vmem>>, vector<128x128xf32>
    %c0_3 = arith.constant 0 : index
    %c0_4 = arith.constant 0 : index
    %2 = vector.load %arg5[%c0_3, %c0_4] : memref<128x128xf32, #tpu.memory_space<vmem>>, vector<128x128xf32>
    %cst = arith.constant 0.000000e+00 : f32
    %3 = vector.broadcast %cst : f32 to vector<128x128xf32>
    %4 = arith.maximumf %1, %3 : vector<128x128xf32>
    %5 = math.absf %1 : vector<128x128xf32>
    %cst_5 = arith.constant 0.000000e+00 : f32
    %6 = vector.broadcast %cst_5 : f32 to vector<128x128xf32>
    %7 = arith.subf %6, %5 : vector<128x128xf32>
    %8 = math.exp %7 : vector<128x128xf32>
    %9 = math.log1p %8 : vector<128x128xf32>
    %10 = arith.addf %4, %9 : vector<128x128xf32>
    %11 = arith.mulf %10, %2 : vector<128x128xf32>
    %12 = arith.addf %0, %11 : vector<128x128xf32>
    %c128_i32 = arith.constant 128 : i32
    %13 = arith.muli %arg0, %c128_i32 : i32
    %c16_i32 = arith.constant 16 : i32
    %14 = arith.subi %c16_i32, %13 : i32
    %c128_i32_6 = arith.constant 128 : i32
    %15 = arith.minsi %14, %c128_i32_6 : i32
    %16 = arith.sitofp %15 : i32 to f32
    %c128_i32_7 = arith.constant 128 : i32
    %17 = arith.muli %arg1, %c128_i32_7 : i32
    %c32_i32 = arith.constant 32 : i32
    %18 = arith.subi %c32_i32, %17 : i32
    %c128_i32_8 = arith.constant 128 : i32
    %19 = arith.minsi %18, %c128_i32_8 : i32
    %20 = arith.sitofp %19 : i32 to f32
    %21 = arith.mulf %16, %20 : f32
    %cst_9 = arith.constant -0.918938517 : f32
    %22 = arith.mulf %21, %cst_9 : f32
    %23 = arith.mulf %12, %12 : vector<128x128xf32>
    %24 = vector.shape_cast %23 : vector<128x128xf32> to vector<1x128x128xf32>
    %cst_10 = arith.constant dense<0.000000e+00> : vector<1xf32>
    %25 = vector.multi_reduction <add>, %24, %cst_10 [1, 2] : vector<1x128x128xf32> to vector<1xf32>
    %26 = vector.shape_cast %25 : vector<1xf32> to vector<1x1x1xf32>
    %27 = vector.extract %26[0, 0, 0] : f32 from vector<1x1x1xf32>
    %28 = vector.broadcast %27 : f32 to vector<1x1xf32>
    %cst_11 = arith.constant 5.000000e-01 : f32
    %29 = vector.broadcast %cst_11 : f32 to vector<1x1xf32>
    %30 = arith.mulf %28, %29 : vector<1x1xf32>
    %31 = vector.broadcast %22 : f32 to vector<1x1xf32>
    %32 = arith.subf %31, %30 : vector<1x1xf32>
    %cst_12 = arith.constant 0.000000e+00 : f32
    %33 = arith.subf %cst_12, %21 : f32
    %cst_13 = arith.constant 0.918938517 : f32
    %34 = arith.mulf %33, %cst_13 : f32
    %35 = math.log %10 : vector<128x128xf32>
    %36 = vector.shape_cast %35 : vector<128x128xf32> to vector<1x128x128xf32>
    %cst_14 = arith.constant dense<0.000000e+00> : vector<1xf32>
    %37 = vector.multi_reduction <add>, %36, %cst_14 [1, 2] : vector<1x128x128xf32> to vector<1xf32>
    %38 = vector.shape_cast %37 : vector<1xf32> to vector<1x1x1xf32>
    %39 = vector.extract %38[0, 0, 0] : f32 from vector<1x1x1xf32>
    %40 = vector.broadcast %39 : f32 to vector<1x1xf32>
    %41 = vector.broadcast %34 : f32 to vector<1x1xf32>
    %42 = arith.subf %41, %40 : vector<1x1xf32>
    %43 = arith.mulf %2, %2 : vector<128x128xf32>
    %44 = vector.shape_cast %43 : vector<128x128xf32> to vector<1x128x128xf32>
    %cst_15 = arith.constant dense<0.000000e+00> : vector<1xf32>
    %45 = vector.multi_reduction <add>, %44, %cst_15 [1, 2] : vector<1x128x128xf32> to vector<1xf32>
    %46 = vector.shape_cast %45 : vector<1xf32> to vector<1x1x1xf32>
    %47 = vector.extract %46[0, 0, 0] : f32 from vector<1x1x1xf32>
    %48 = vector.broadcast %47 : f32 to vector<1x1xf32>
    %cst_16 = arith.constant 5.000000e-01 : f32
    %49 = vector.broadcast %cst_16 : f32 to vector<1x1xf32>
    %50 = arith.mulf %49, %48 : vector<1x1xf32>
    %51 = arith.subf %42, %50 : vector<1x1xf32>
    %c0_17 = arith.constant 0 : index
    %c0_18 = arith.constant 0 : index
    %52 = vector.load %arg8[%c0_17, %c0_18] : memref<1x128xf32, #tpu.memory_space<vmem>>, vector<1x128xf32>
    %c0_19 = arith.constant 0 : index
    %c0_20 = arith.constant 0 : index
    %53 = vector.load %arg7[%c0_19, %c0_20] : memref<1x128xf32, #tpu.memory_space<vmem>>, vector<1x128xf32>
    %cst_21 = arith.constant 0.000000e+00 : f32
    %54 = vector.broadcast %cst_21 : f32 to vector<1x128xf32>
    %55 = arith.maximumf %53, %54 : vector<1x128xf32>
    %56 = math.absf %53 : vector<1x128xf32>
    %cst_22 = arith.constant 0.000000e+00 : f32
    %57 = vector.broadcast %cst_22 : f32 to vector<1x128xf32>
    %58 = arith.subf %57, %56 : vector<1x128xf32>
    %59 = math.exp %58 : vector<1x128xf32>
    %60 = math.log1p %59 : vector<1x128xf32>
    %61 = arith.addf %55, %60 : vector<1x128xf32>
    %c0_23 = arith.constant 0 : index
    %c0_24 = arith.constant 0 : index
    %62 = vector.load %arg6[%c0_23, %c0_24] : memref<1x128xf32, #tpu.memory_space<vmem>>, vector<1x128xf32>
    %63 = arith.mulf %61, %52 : vector<1x128xf32>
    %64 = arith.addf %62, %63 : vector<1x128xf32>
    %c0_i32 = arith.constant 0 : i32
    %65 = arith.cmpi eq, %arg1, %c0_i32 : i32
    %66 = arith.extui %65 : i1 to i32
    %c0_i32_25 = arith.constant 0 : i32
    %67 = arith.cmpi ne, %66, %c0_i32_25 : i32
    scf.if %67 {
      %cst_47 = arith.constant 0.000000e+00 : f32
      %89 = vector.broadcast %cst_47 : f32 to vector<8x128xf32>
      %c0_48 = arith.constant 0 : index
      %c0_49 = arith.constant 0 : index
      %90 = vector.load %arg12[%c0_48, %c0_49] : memref<8x128xf32, #tpu.memory_space<vmem>>, vector<8x128xf32>
      tpu.vector_store %arg12[%c0_48, %c0_49], %89 {strides = array<i32>} : memref<8x128xf32, #tpu.memory_space<vmem>>, vector<8x128xf32>,
      %c128_i32_50 = arith.constant 128 : i32
      %91 = arith.muli %arg0, %c128_i32_50 : i32
      %c16_i32_51 = arith.constant 16 : i32
      %92 = arith.subi %c16_i32_51, %91 : i32
      %c128_i32_52 = arith.constant 128 : i32
      %93 = arith.minsi %92, %c128_i32_52 : i32
      %94 = arith.sitofp %93 : i32 to f32
      %cst_53 = arith.constant -0.918938517 : f32
      %95 = arith.mulf %94, %cst_53 : f32
      %96 = arith.mulf %64, %64 : vector<1x128xf32>
      %97 = vector.shape_cast %96 : vector<1x128xf32> to vector<1x1x128xf32>
      %cst_54 = arith.constant dense<0.000000e+00> : vector<1xf32>
      %98 = vector.multi_reduction <add>, %97, %cst_54 [1, 2] : vector<1x1x128xf32> to vector<1xf32>
      %99 = vector.shape_cast %98 : vector<1xf32> to vector<1x1x1xf32>
      %100 = vector.extract %99[0, 0, 0] : f32 from vector<1x1x1xf32>
      %101 = vector.broadcast %100 : f32 to vector<1x1xf32>
      %cst_55 = arith.constant 5.000000e-01 : f32
      %102 = vector.broadcast %cst_55 : f32 to vector<1x1xf32>
      %103 = arith.mulf %101, %102 : vector<1x1xf32>
      %104 = vector.broadcast %95 : f32 to vector<1x1xf32>
      %105 = arith.subf %104, %103 : vector<1x1xf32>
      %c0_56 = arith.constant 0 : index
      %c0_57 = arith.constant 0 : index
      %c0_58 = arith.constant 0 : index
      %106 = vector.load %arg10[%c0_56, %c0_57, %c0_58] : memref<1x1x1xf32, #tpu.memory_space<vmem>>, vector<1x1x1xf32>
      %107 = vector.shape_cast %106 : vector<1x1x1xf32> to vector<1x1xf32>
      %108 = vector.shape_cast %105 : vector<1x1xf32> to vector<1x1x1xf32>
      tpu.vector_store %arg10[%c0_56, %c0_57, %c0_58], %108 {strides = array<i32>} : memref<1x1x1xf32, #tpu.memory_space<vmem>>, vector<1x1x1xf32>,
      %cst_59 = arith.constant 0.000000e+00 : f32
      %109 = arith.subf %cst_59, %94 : f32
      %cst_60 = arith.constant 0.918938517 : f32
      %110 = arith.mulf %109, %cst_60 : f32
      %111 = math.log %61 : vector<1x128xf32>
      %112 = vector.shape_cast %111 : vector<1x128xf32> to vector<1x1x128xf32>
      %cst_61 = arith.constant dense<0.000000e+00> : vector<1xf32>
      %113 = vector.multi_reduction <add>, %112, %cst_61 [1, 2] : vector<1x1x128xf32> to vector<1xf32>
      %114 = vector.shape_cast %113 : vector<1xf32> to vector<1x1x1xf32>
      %115 = vector.extract %114[0, 0, 0] : f32 from vector<1x1x1xf32>
      %116 = vector.broadcast %115 : f32 to vector<1x1xf32>
      %117 = vector.broadcast %110 : f32 to vector<1x1xf32>
      %118 = arith.subf %117, %116 : vector<1x1xf32>
      %119 = arith.mulf %52, %52 : vector<1x128xf32>
      %120 = vector.shape_cast %119 : vector<1x128xf32> to vector<1x1x128xf32>
      %cst_62 = arith.constant dense<0.000000e+00> : vector<1xf32>
      %121 = vector.multi_reduction <add>, %120, %cst_62 [1, 2] : vector<1x1x128xf32> to vector<1xf32>
      %122 = vector.shape_cast %121 : vector<1xf32> to vector<1x1x1xf32>
      %123 = vector.extract %122[0, 0, 0] : f32 from vector<1x1x1xf32>
      %124 = vector.broadcast %123 : f32 to vector<1x1xf32>
      %cst_63 = arith.constant 5.000000e-01 : f32
      %125 = vector.broadcast %cst_63 : f32 to vector<1x1xf32>
      %126 = arith.mulf %125, %124 : vector<1x1xf32>
      %127 = arith.subf %118, %126 : vector<1x1xf32>
      %c0_64 = arith.constant 0 : index
      %c0_65 = arith.constant 0 : index
      %c0_66 = arith.constant 0 : index
      %128 = vector.load %arg11[%c0_64, %c0_65, %c0_66] : memref<1x1x1xf32, #tpu.memory_space<vmem>>, vector<1x1x1xf32>
      %129 = vector.shape_cast %128 : vector<1x1x1xf32> to vector<1x1xf32>
      %130 = vector.shape_cast %127 : vector<1x1xf32> to vector<1x1x1xf32>
      tpu.vector_store %arg11[%c0_64, %c0_65, %c0_66], %130 {strides = array<i32>} : memref<1x1x1xf32, #tpu.memory_space<vmem>>, vector<1x1x1xf32>,
    } else {
    }
    %c0_26 = arith.constant 0 : index
    %c0_27 = arith.constant 0 : index
    %c0_28 = arith.constant 0 : index
    %68 = vector.load %arg10[%c0_26, %c0_27, %c0_28] : memref<1x1x1xf32, #tpu.memory_space<vmem>>, vector<1x1x1xf32>
    %69 = vector.shape_cast %68 : vector<1x1x1xf32> to vector<1x1xf32>
    %70 = arith.addf %69, %32 : vector<1x1xf32>
    %c0_29 = arith.constant 0 : index
    %c0_30 = arith.constant 0 : index
    %c0_31 = arith.constant 0 : index
    %71 = vector.load %arg10[%c0_29, %c0_30, %c0_31] : memref<1x1x1xf32, #tpu.memory_space<vmem>>, vector<1x1x1xf32>
    %72 = vector.shape_cast %71 : vector<1x1x1xf32> to vector<1x1xf32>
    %73 = vector.shape_cast %70 : vector<1x1xf32> to vector<1x1x1xf32>
    tpu.vector_store %arg10[%c0_29, %c0_30, %c0_31], %73 {strides = array<i32>} : memref<1x1x1xf32, #tpu.memory_space<vmem>>, vector<1x1x1xf32>,
    %c0_32 = arith.constant 0 : index
    %c0_33 = arith.constant 0 : index
    %c0_34 = arith.constant 0 : index
    %74 = vector.load %arg11[%c0_32, %c0_33, %c0_34] : memref<1x1x1xf32, #tpu.memory_space<vmem>>, vector<1x1x1xf32>
    %75 = vector.shape_cast %74 : vector<1x1x1xf32> to vector<1x1xf32>
    %76 = arith.addf %75, %51 : vector<1x1xf32>
    %c0_35 = arith.constant 0 : index
    %c0_36 = arith.constant 0 : index
    %c0_37 = arith.constant 0 : index
    %77 = vector.load %arg11[%c0_35, %c0_36, %c0_37] : memref<1x1x1xf32, #tpu.memory_space<vmem>>, vector<1x1x1xf32>
    %78 = vector.shape_cast %77 : vector<1x1x1xf32> to vector<1x1xf32>
    %79 = vector.shape_cast %76 : vector<1x1xf32> to vector<1x1x1xf32>
    tpu.vector_store %arg11[%c0_35, %c0_36, %c0_37], %79 {strides = array<i32>} : memref<1x1x1xf32, #tpu.memory_space<vmem>>, vector<1x1x1xf32>,
    %80 = tpu.transpose %12, [1, 0] : vector<128x128xf32> -> vector<128x128xf32>
    %c0_38 = arith.constant 0 : index
    %c0_39 = arith.constant 0 : index
    %81 = vector.load %arg2[%c0_38, %c0_39] : memref<8x128xf32, #tpu.memory_space<vmem>>, vector<8x128xf32>
    %c0_40 = arith.constant 0 : index
    %c0_41 = arith.constant 0 : index
    %82 = vector.load %arg12[%c0_40, %c0_41] : memref<8x128xf32, #tpu.memory_space<vmem>>, vector<8x128xf32>
    %cst_42 = arith.constant dense<0.000000e+00> : vector<8x128xf32>
    %83 = tpu.matmul %81, %80, %cst_42 {dimension_numbers = #tpu.dot_dimension_numbers<[1], [0], [0], [1], [0, 0, 1, 1], [], []>} : vector<8x128xf32>, vector<128x128xf32>, vector<8x128xf32> -> vector<8x128xf32>
    %84 = arith.addf %82, %83 : vector<8x128xf32>
    %c0_43 = arith.constant 0 : index
    %c0_44 = arith.constant 0 : index
    %85 = vector.load %arg12[%c0_43, %c0_44] : memref<8x128xf32, #tpu.memory_space<vmem>>, vector<8x128xf32>
    tpu.vector_store %arg12[%c0_43, %c0_44], %84 {strides = array<i32>} : memref<8x128xf32, #tpu.memory_space<vmem>>, vector<8x128xf32>,
    %c0_i32_45 = arith.constant 0 : i32
    %86 = arith.cmpi eq, %arg1, %c0_i32_45 : i32
    %87 = arith.extui %86 : i1 to i32
    %c0_i32_46 = arith.constant 0 : i32
    %88 = arith.cmpi ne, %87, %c0_i32_46 : i32
    scf.if %88 {
      %c0_47 = arith.constant 0 : index
      %c0_48 = arith.constant 0 : index
      %89 = vector.load %arg12[%c0_47, %c0_48] : memref<8x128xf32, #tpu.memory_space<vmem>>, vector<8x128xf32>
      %90 = vector.broadcast %64 : vector<1x128xf32> to vector<8x128xf32>
      %91 = arith.addf %89, %90 : vector<8x128xf32>
      %c0_49 = arith.constant 0 : index
      %c0_50 = arith.constant 0 : index
      %92 = vector.load %arg9[%c0_49, %c0_50] : memref<8x128xf32, #tpu.memory_space<vmem>>, vector<8x128xf32>
      tpu.vector_store %arg9[%c0_49, %c0_50], %91 {strides = array<i32>} : memref<8x128xf32, #tpu.memory_space<vmem>>, vector<8x128xf32>,
    } else {
    }
    return
  }
  func.func @transform_0(%arg0: i32, %arg1: i32) -> (i32, i32) {
    %c0_i32 = arith.constant 0 : i32
    %c0_i32_0 = arith.constant 0 : i32
    return %c0_i32, %arg1 : i32, i32
  }
  func.func @transform_1(%arg0: i32, %arg1: i32) -> (i32, i32) {
    %c0_i32 = arith.constant 0 : i32
    return %arg0, %arg1 : i32, i32
  }
  func.func @transform_2(%arg0: i32, %arg1: i32) -> (i32, i32) {
    %c0_i32 = arith.constant 0 : i32
    return %arg0, %arg1 : i32, i32
  }
  func.func @transform_3(%arg0: i32, %arg1: i32) -> (i32, i32) {
    %c0_i32 = arith.constant 0 : i32
    return %arg0, %arg1 : i32, i32
  }
  func.func @transform_4(%arg0: i32, %arg1: i32) -> (i32, i32) {
    %c0_i32 = arith.constant 0 : i32
    %c0_i32_0 = arith.constant 0 : i32
    return %c0_i32, %arg0 : i32, i32
  }
  func.func @transform_5(%arg0: i32, %arg1: i32) -> (i32, i32) {
    %c0_i32 = arith.constant 0 : i32
    %c0_i32_0 = arith.constant 0 : i32
    return %c0_i32, %arg0 : i32, i32
  }
  func.func @transform_6(%arg0: i32, %arg1: i32) -> (i32, i32) {
    %c0_i32 = arith.constant 0 : i32
    %c0_i32_0 = arith.constant 0 : i32
    return %c0_i32, %arg0 : i32, i32
  }
  func.func @transform_7(%arg0: i32, %arg1: i32) -> (i32, i32) {
    %c0_i32 = arith.constant 0 : i32
    %c0_i32_0 = arith.constant 0 : i32
    return %c0_i32, %arg0 : i32, i32
  }
  func.func @transform_8(%arg0: i32, %arg1: i32) -> (i32, i32, i32) {
    %c0_i32 = arith.constant 0 : i32
    %c0_i32_0 = arith.constant 0 : i32
    %c0_i32_1 = arith.constant 0 : i32
    return %arg0, %c0_i32, %c0_i32_0 : i32, i32, i32
  }
  func.func @transform_9(%arg0: i32, %arg1: i32) -> (i32, i32, i32) {
    %c0_i32 = arith.constant 0 : i32
    %c0_i32_0 = arith.constant 0 : i32
    %c0_i32_1 = arith.constant 0 : i32
    return %arg0, %c0_i32, %c0_i32_0 : i32, i32, i32
  }
}

</mosaic_0001>

<bundles_post_ra>
// kernel: tpu_custom_call.1
= control target key start
LH: loop header
LB: loop body
LE: loop exit
PB: predicated region body
PF: predicated region fallthrough
CT: control target
= control target key end

     0   :  { %15 = vsyncpa [#allocation4], 0  ;;  %s1676_s0 = inlined_call_operand.hbm [shape: f32[8,128], index: 0, kind: input, shape index: {}]   ;;  %s1677_s1 = inlined_call_operand.hbm [shape: f32[128,128], index: 1, kind: input, shape index: {}]   ;;  %s1678_s2 = inlined_call_operand.hbm [shape: f32[128,128], index: 2, kind: input, shape index: {}]   ;;  %s1679_s3 = inlined_call_operand.hbm [shape: f32[128,128], index: 3, kind: input, shape index: {}]   ;;  %s1680_s4 = inlined_call_operand.vmem [shape: f32[1,128], index: 4, kind: input, shape index: {}]   ;;  %s1681_s5 = inlined_call_operand.vmem [shape: f32[1,128], index: 5, kind: input, shape index: {}]   ;;  %s1682_s6 = inlined_call_operand.vmem [shape: f32[1,128], index: 6, kind: input, shape index: {}]   ;;  %s1683_s7 = inlined_call_operand.hbm [shape: f32[8,128], index: 7, kind: output, shape index: {0}]   ;;  %s1684_s8 = inlined_call_operand.hbm [shape: f32[1,1,1], index: 8, kind: output, shape index: {1}]   ;;  %s1685_s9 = inlined_call_operand.hbm [shape: f32[1,1,1], index: 9, kind: output, shape index: {2}]  }
   0x1   :  { %16 = vsyncpa [#allocation7], 0 }
   0x2   :  { %17 = vsyncpa [#allocation10], 0 }
   0x3   :  { %18 = vsyncpa [#allocation5], 0 }
   0x4   :  { %19 = vsyncpa [#allocation13], 0  ;;  %s1104_s30 = smov [#allocation6]  }
   0x5   :  { %s35_s10 = sshll.u32 %s1104_s30, 4  ;;  %s36_s10 = int_to_ptr.vmem [resolvable:$true] %s35_s10 }
   0x6   :  { %s962_s11 = scalar_lea.vmem %s36_s10, 2048  ;;  %p967_p1 = scmp.lt.s32.totalorder %s36_s10, %s36_s10 }
   0x7   :  { %p963_p0 = scmp.ne.s32.totalorder %s36_s10, %s962_s11  ;;  %p968_p2 = scmp.lt.s32.totalorder %s962_s11, %s962_s11 }
   0x9   :  { %p969_p3 = por %p968_p2, %p967_p1 }
   0xb   :  { %p970_p4 = pnand %p969_p3, %p963_p0 }
   0xd   :  { %973 = shalt.err (!%p970_p4)
}
   0xe   :  { %s1105_s12 = smov 128   ;;  %s1106_s13 = smov 8  }
   0xf   :  { %41 = dma.hbm_to_vmem [thread:$0]  %s1677_s1, 2048, %s36_s10, [#allocation7], %s1105_s12, %s1105_s12, %s1106_s13  }
  0x10   :  { %s1107_s16 = smov [#allocation3]   ;;  %s1108_s18 = smov [#allocation8]  }
  0x11   :  { %s26_s17 = sshll.u32 %s1107_s16, 4  ;;  %s47_s19 = sshll.u32 %s1108_s18, 4  ;;  %s27_s17 = int_to_ptr.vmem [resolvable:$true] %s26_s17  ;;  %s48_s19 = int_to_ptr.vmem [resolvable:$true] %s47_s19 }
  0x12   :  { %s982_s20 = scalar_lea.vmem %s27_s17, 128  ;;  %p987_p6 = scmp.lt.s32.totalorder %s27_s17, %s27_s17 }
  0x13   :  { %p983_p5 = scmp.ne.s32.totalorder %s27_s17, %s982_s20  ;;  %p988_p7 = scmp.lt.s32.totalorder %s982_s20, %s982_s20 }
  0x15   :  { %p989_p8 = por %p988_p7, %p987_p6 }
  0x17   :  { %p990_p9 = pnand %p989_p8, %p983_p5 }
  0x19   :  { %993 = shalt.err (!%p990_p9)
}
  0x1a   :  { %29 = dma.hbm_to_vmem [thread:$0]  %s1676_s0, 128, %s27_s17, [#allocation4]  }
  0x1b   :  { %s1002_s23 = scalar_lea.vmem %s48_s19, 2048  ;;  %p1007_p11 = scmp.lt.s32.totalorder %s48_s19, %s48_s19 }
  0x1c   :  { %p1003_p10 = scmp.ne.s32.totalorder %s48_s19, %s1002_s23  ;;  %p1008_p12 = scmp.lt.s32.totalorder %s1002_s23, %s1002_s23 }
  0x1e   :  { %p1009_p13 = por %p1008_p12, %p1007_p11 }
  0x20   :  { %p1010_p0 = pnand %p1009_p13, %p1003_p10 }
  0x22   :  { %1013 = shalt.err (!%p1010_p0)
}
  0x23   :  { %53 = dma.hbm_to_vmem [thread:$0]  %s1678_s2, 2048, %s48_s19, [#allocation7], %s1105_s12, %s1105_s12, %s1106_s13  }
  0x24   :  { %s1109_s25 = smov [#allocation9]  }
  0x25   :  { %s59_s26 = sshll.u32 %s1109_s25, 4  ;;  %s60_s26 = int_to_ptr.vmem [resolvable:$true] %s59_s26 }
  0x26   :  { %s1022_s27 = scalar_lea.vmem %s60_s26, 2048  ;;  %p1027_p2 = scmp.lt.s32.totalorder %s60_s26, %s60_s26 }
  0x27   :  { %p1023_p1 = scmp.ne.s32.totalorder %s60_s26, %s1022_s27  ;;  %p1028_p3 = scmp.lt.s32.totalorder %s1022_s27, %s1022_s27 }
  0x29   :  { %p1029_p4 = por %p1028_p3, %p1027_p2 }
  0x2b   :  { %p1030_p5 = pnand %p1029_p4, %p1023_p1 }
  0x2d   :  { %1033 = shalt.err (!%p1030_p5)
}
  0x2e   :  { %65 = dma.hbm_to_vmem [thread:$0]  %s1679_s3, 2048, %s60_s26, [#allocation10], %s1105_s12, %s1105_s12, %s1106_s13  }
  0x2f   :  { %1094 = dma.done.wait [#allocation4], 128  }
  0x30   :  { %1095 = vsyncadd [#allocation4], 4294967168 }
  0x31   :  { %1096 = dma.done.wait [#allocation7], 4096  }
  0x32   :  { %1097 = vsyncadd [#allocation7], 4294963200 }
  0x33   :  { %1098 = dma.done.wait [#allocation10], 2048  }
  0x34   :  { %1099 = vsyncadd [#allocation10], 4294965248  ;;  %v1686_v0 = vmov 0.0   ;;  %v1187_v1 = vld [vmem:[#allocation8 + $0x78] sm:$0xff]  ;;  %v1190_v3 = vld [vmem:[#allocation8 + $0x70] sm:$0xff]  ;;  %vm1111_vm0 = vmmov 0  }
  0x35   :  { %794 = vmatprep.subr.mxu0 %v1686_v0  ;;  %v163_v2 = vand.u32 2147483647, %v1187_v1  ;;  %v162_v4 = vand.u32 2147483647, %v1190_v3  ;;  %v1193_v5 = vld [vmem:[#allocation8 + $0x68] sm:$0xff]  ;;  %v1196_v8 = vld [vmem:[#allocation8 + $0x60] sm:$0xff]  ;;  %826 = vmatprep.mubr.msk.f32.mxu0 %vm1111_vm0, %v1686_v0 }
  0x36   :  { %v161_v7 = vand.u32 2147483647, %v1193_v5  ;;  %v160_v10 = vand.u32 2147483647, %v1196_v8  ;;  %v1199_v13 = vld [vmem:[#allocation8 + $0x58] sm:$0xff]  ;;  %v1202_v18 = vld [vmem:[#allocation8 + $0x50] sm:$0xff] }
  0x37   :  { %v179_v6 = vsub.f32 0.0, %v163_v2  ;;  %v178_v9 = vsub.f32 0.0, %v162_v4  ;;  %v159_v16 = vand.u32 2147483647, %v1199_v13  ;;  %v1204_v21 = vld [vmem:[#allocation8 + $0x48] sm:$0xff]  ;;  %v147_v29 = vmax.f32 %v1187_v1, 0.0 }
  0x38   :  { %v177_v12 = vsub.f32 0.0, %v161_v7  ;;  %v176_v15 = vsub.f32 0.0, %v160_v10  ;;  %v158_v22 = vand.u32 2147483647, %v1202_v18  ;;  %v157_v24 = vand.u32 2147483647, %v1204_v21 }
  0x39   :  { %v210_v11 = vmul.f32 1.442695, %v179_v6  ;;  %v208_v14 = vmul.f32 1.442695, %v178_v9  ;;  %v175_v20 = vsub.f32 0.0, %v159_v16  ;;  %v1212_v32 = vld [vmem:[#allocation9 + $0x50] sm:$0xff] }
  0x3a   :  { %v206_v17 = vmul.f32 1.442695, %v177_v12  ;;  %v204_v19 = vmul.f32 1.442695, %v176_v15  ;;  %v174_v25 = vsub.f32 0.0, %v158_v22  ;;  %v173_v26 = vsub.f32 0.0, %v157_v24 }
  0x3b   :  { %852 = vpow2.f32 %v210_v11  ;;  %v202_v23 = vmul.f32 1.442695, %v175_v20  ;;  %v1214_v33 = vld [vmem:[#allocation9 + $0x48] sm:$0xff]  ;;  %v1216_v34 = vld [vmem:[#allocation8] sm:$0xff]  ;;  %v1223_v38 = vmul.f32 %v1212_v32, %v1212_v32  ;;  %v1227_v40 = vld [vmem:[#allocation8 + $0x10] sm:$0xff]  ;;  %v1720_v0 = vmax.f32 %v1193_v5, 0.0 }
  0x3c   :  { %854 = vpow2.f32 %v208_v14  ;;  %v200_v27 = vmul.f32 1.442695, %v174_v25  ;;  %v198_v28 = vmul.f32 1.442695, %v173_v26  ;;  %v1225_v39 = vld [vmem:[#allocation8 + $0x8] sm:$0xff]  ;;  %v1229_v41 = vld [vmem:[#allocation8 + $0x18] sm:$0xff]  ;;  %v1234_v43 = vmul.f32 %v1214_v33, %v1214_v33 }
  0x3d   :  { %856 = vpow2.f32 %v206_v17  ;;  %1703 = vst [vmem:[#allocation20_spill] sm:$0xff] %v1223_v38  ;;  %v1236_v44 = vld [vmem:[#allocation8 + $0x20] sm:$0xff]  ;;  %v1238_v45 = vld [vmem:[#allocation8 + $0x28] sm:$0xff]  ;;  %v1240_v46 = vld [vmem:[#allocation8 + $0x30] sm:$0xff]  ;;  %v148_v54 = vand.u32 2147483647, %v1216_v34 }
  0x3e   :  { %858 = vpow2.f32 %v204_v19  ;;  %v1244_v50 = vld [vmem:[#allocation9] sm:$0xff]  ;;  %v1250_v57 = vld [vmem:[#allocation9 + $0x8] sm:$0xff]  ;;  %v149_v58 = vand.u32 2147483647, %v1225_v39  ;;  %v150_v59 = vand.u32 2147483647, %v1227_v40 }
  0x3f   :  { %860 = vpow2.f32 %v202_v23  ;;  %v1256_v60 = vmul.f32 %v1244_v50, %v1244_v50  ;;  %v1258_v63 = vld [vmem:[#allocation8 + $0x38] sm:$0xff]  ;;  %v151_v2 = vand.u32 2147483647, %v1229_v41  ;;  %v152_v4 = vand.u32 2147483647, %v1236_v44  ;;  %v1266_v11 = vld [vmem:[#allocation8 + $0x40] sm:$0xff] }
  0x40   :  { %862 = vpow2.f32 %v200_v27  ;;  %v1264_v6 = vmul.f32 %v1250_v57, %v1250_v57  ;;  %v153_v12 = vand.u32 2147483647, %v1238_v45  ;;  %v154_v16 = vand.u32 2147483647, %v1240_v46 }
  0x41   :  { %864 = vpow2.f32 %v198_v28  ;;  %v155_v22 = vand.u32 2147483647, %v1258_v63  ;;  %v164_v26 = vsub.f32 0.0, %v148_v54  ;;  %v165_v51 = vsub.f32 0.0, %v149_v58 }
  0x42   :  { %v167_v30 = vsub.f32 0.0, %v151_v2 }
  0x48   :  { %v853_v49 = vpop.eup %852 }
  0x49   :  { %v855_v55 = vpop.eup %854  ;;  %v347_v56 = vadd.f32 1.0, %v853_v49  ;;  %v350_v9 = vmul.f32 -0.5, %v853_v49  ;;  %v353_v14 = vand.u32 2147483647, %v853_v49 }
  0x4a   :  { %v857_v61 = vpop.eup %856  ;;  %v338_v62 = vadd.f32 1.0, %v855_v55  ;;  %v341_v15 = vmul.f32 -0.5, %v855_v55  ;;  %v344_v23 = vand.u32 2147483647, %v855_v55 }
  0x4b   :  { %v859_v7 = vpop.eup %858  ;;  %866 = vlog2.f32 %v347_v56  ;;  %v329_v10 = vadd.f32 1.0, %v857_v61  ;;  %v332_v19 = vmul.f32 -0.5, %v857_v61  ;;  %v351_v27 = vadd.f32 1.0, %v350_v9 }
  0x4c   :  { %868 = vlog2.f32 %v338_v62  ;;  %v861_v17 = vpop.eup %860  ;;  %v320_v20 = vadd.f32 1.0, %v859_v7  ;;  %v323_v24 = vmul.f32 -0.5, %v859_v7  ;;  %vm1274_vm1 = vcmp.lt.f32.partialorder %v353_v14, 0.0004427343 }
  0x4d   :  { %870 = vlog2.f32 %v329_v10  ;;  %v311_v28 = vadd.f32 1.0, %v861_v17  ;;  %v314_v56 = vmul.f32 -0.5, %v861_v17  ;;  %v1272_v53 = vpop.eup %862  ;;  %v342_v10 = vadd.f32 1.0, %v341_v15 }
  0x4e   :  { %872 = vlog2.f32 %v320_v20  ;;  %v335_v52 = vand.u32 2147483647, %v857_v61  ;;  %v1278_v48 = vpop.eup %864  ;;  %v333_v47 = vadd.f32 1.0, %v332_v19  ;;  %v302_v42 = vadd.f32 1.0, %v1272_v53 }
  0x4f   :  { %874 = vlog2.f32 %v311_v28  ;;  %v305_v54 = vmul.f32 -0.5, %v1272_v53  ;;  %v324_v9 = vadd.f32 1.0, %v323_v24  ;;  %v326_v20 = vand.u32 2147483647, %v859_v7 }
  0x50   :  { %v317_v37 = vand.u32 2147483647, %v861_v17  ;;  %v293_v36 = vadd.f32 1.0, %v1278_v48  ;;  %v352_v14 = vmul.f32 %v853_v49, %v351_v27  ;;  %vm1283_vm2 = vcmp.lt.f32.partialorder %v344_v23, 0.0004427343 }
  0x51   :  { %v315_v15 = vadd.f32 1.0, %v314_v56  ;;  %876 = vlog2.f32 %v302_v42  ;;  %v343_v58 = vmul.f32 %v855_v55, %v342_v10  ;;  %v306_v35 = vadd.f32 1.0, %v305_v54 }
  0x52   :  { %878 = vlog2.f32 %v293_v36  ;;  %v166_v19 = vsub.f32 0.0, %v150_v59  ;;  %v334_v28 = vmul.f32 %v857_v61, %v333_v47  ;;  %vm1287_vm3 = vcmp.lt.f32.partialorder %v335_v52, 0.0004427343 }
  0x53   :  { %v296_v24 = vmul.f32 -0.5, %v1278_v48  ;;  %v325_v25 = vmul.f32 %v859_v7, %v324_v9  ;;  %vm1292_vm4 = vcmp.lt.f32.partialorder %v326_v20, 0.0004427343  ;;  %vm1296_vm5 = vcmp.lt.f32.partialorder %v317_v37, 0.0004427343 }
  0x54   :  { %v168_v42 = vsub.f32 0.0, %v152_v4  ;;  %v1300_v36 = vmul.f32 %v861_v17, %v315_v15  ;;  %v308_v47 = vand.u32 2147483647, %v1272_v53  ;;  %v180_v52 = vmul.f32 1.442695, %v164_v26  ;;  %v1307_v26 = vld [vmem:[#allocation9 + $0x78] sm:$0xff] }
  0x55   :  { %v182_v55 = vmul.f32 1.442695, %v165_v51  ;;  %v1304_v61 = vmul.f32 %v1272_v53, %v306_v35  ;;  %v299_v2 = vand.u32 2147483647, %v1278_v48  ;;  %v169_v7 = vsub.f32 0.0, %v153_v12  ;;  %1714 = vst [vmem:[#allocation21_spill] sm:$0xff] %v1307_v26 }
  0x56   :  { %v184_v27 = vmul.f32 1.442695, %v166_v19  ;;  %v297_v10 = vadd.f32 1.0, %v296_v24  ;;  %880 = vpow2.f32 %v180_v52  ;;  %v186_v54 = vmul.f32 1.442695, %v167_v30  ;;  %v1315_v19 = vld [vmem:[#allocation9 + $0x70] sm:$0xff] }
  0x57   :  { %v170_v9 = vsub.f32 0.0, %v154_v16  ;;  %882 = vpow2.f32 %v182_v55  ;;  %v188_v20 = vmul.f32 1.442695, %v168_v42  ;;  %v171_v53 = vsub.f32 0.0, %v155_v22  ;;  %1716 = vst [vmem:[#allocation23_spill] sm:$0xff] %v1315_v19  ;;  %v99_v52 = vld [vmem:[#allocation6 + $0x78] sm:$0xff] }
  0x58   :  { %v867_v59 = vpop.eup %866  ;;  %884 = vpow2.f32 %v184_v27  ;;  %v1717_v16 = vand.u32 2147483647, %v1266_v11  ;;  %v190_v42 = vmul.f32 1.442695, %v169_v7  ;;  %v1718_v62 = vmax.f32 %v1190_v3, 0.0  ;;  %v98_v7 = vld [vmem:[#allocation6 + $0x70] sm:$0xff] }
  0x59   :  { %v869_v56 = vpop.eup %868  ;;  %v349_v37 = vmul.f32 0.6931472, %v867_v59  ;;  %886 = vpow2.f32 %v186_v54  ;;  %v192_v59 = vmul.f32 1.442695, %v170_v9  ;;  %v1335_v27 = vld [vmem:[#allocation9 + $0x68] sm:$0xff]  ;;  %v1728_v9 = vmax.f32 %v1196_v8, 0.0 }
  0x5a   :  { %v871_v4 = vpop.eup %870  ;;  %v340_v17 = vmul.f32 0.6931472, %v869_v56  ;;  %v172_v24 = vsub.f32 0.0, %v1717_v16  ;;  %888 = vpow2.f32 %v188_v20  ;;  %1722 = vst [vmem:[#allocation26_spill] sm:$0xff] %v1335_v27  ;;  %v194_v56 = vmul.f32 1.442695, %v171_v53 }
  0x5b   :  { %v355_v35 = vsel %vm1274_vm1, %v352_v14, %v349_v37  ;;  %v331_v51 = vmul.f32 0.6931472, %v871_v4  ;;  %v873_v12 = vpop.eup %872  ;;  %vm1341_vm6 = vcmp.lt.f32.partialorder %v308_v47, 0.0004427343  ;;  %vm1345_vm7 = vcmp.lt.f32.partialorder %v299_v2, 0.0004427343 }
  0x5c   :  { %v1313_v15 = vadd.f32 %v355_v35, %v147_v29  ;;  %v346_v30 = vsel %vm1283_vm2, %v343_v58, %v340_v17  ;;  %v322_v1 = vmul.f32 0.6931472, %v873_v12  ;;  %v875_v29 = vpop.eup %874  ;;  %890 = vpow2.f32 %v190_v42  ;;  %v97_v12 = vld [vmem:[#allocation6 + $0x68] sm:$0xff] }
  0x5d   :  { %v1323_v14 = vadd.f32 %v346_v30, %v1718_v62  ;;  %v337_v22 = vsel %vm1287_vm3, %v334_v28, %v331_v51  ;;  %v313_v28 = vmul.f32 0.6931472, %v875_v29  ;;  %v298_v47 = vmul.f32 %v1278_v48, %v297_v10  ;;  %v1362_v51 = vld [vmem:[#allocation9 + $0x60] sm:$0xff]  ;;  %v1368_v48 = vld [vmem:[#allocation9 + $0x10] sm:$0xff]  ;;  %v1382_v62 = vld [vmem:[#allocation9 + $0x58] sm:$0xff] }
  0x5e   :  { %1715 = vst [vmem:[#allocation22_spill] sm:$0xff] %v1313_v15  ;;  %v387_v55 = vmul.f32 %v1313_v15, %v1307_v26  ;;  %v1331_v58 = vadd.f32 %v337_v22, %v1720_v0  ;;  %v328_v31 = vsel %vm1292_vm4, %v325_v25, %v322_v1  ;;  %v877_v37 = vpop.eup %876  ;;  %892 = vpow2.f32 %v192_v59  ;;  %v1386_v1 = vld [vmem:[#allocation9 + $0x18] sm:$0xff]  ;;  %v1442_v29 = vld [vmem:[#allocation9 + $0x40] sm:$0xff] }
  0x5f   :  { %1719 = vst [vmem:[#allocation24_spill] sm:$0xff] %v1323_v14  ;;  %v386_v3 = vmul.f32 %v1323_v14, %v1315_v19  ;;  %v879_v17 = vpop.eup %878  ;;  %v1351_v20 = vadd.f32 %v328_v31, %v1728_v9  ;;  %v319_v25 = vsel %vm1296_vm5, %v1300_v36, %v313_v28  ;;  %v304_v49 = vmul.f32 0.6931472, %v877_v37  ;;  %v1414_v9 = vld [vmem:[#allocation9 + $0x28] sm:$0xff] }
  0x60   :  { %1721 = vst [vmem:[#allocation25_spill] sm:$0xff] %v1331_v58  ;;  %v1339_v54 = vadd.f32 %v387_v55, %v99_v52  ;;  %v385_v2 = vmul.f32 %v1331_v58, %v1335_v27  ;;  %v196_v8 = vmul.f32 1.442695, %v172_v24  ;;  %v1731_v53 = vmov 0.0  }
  0x61   :  { %1729 = vst [vmem:[#allocation28_spill] sm:$0xff] %v1351_v20  ;;  %v1358_v35 = vadd.f32 %v386_v3, %v98_v7  ;;  %v310_v23 = vsel %vm1341_vm6, %v1304_v61, %v304_v49  ;;  %v295_v36 = vmul.f32 0.6931472, %v879_v17  ;;  %894 = vpow2.f32 %v194_v56  ;;  %v1397_v7 = vld [vmem:[#allocation9 + $0x20] sm:$0xff]  ;;  %v1418_v49 = vld [vmem:[#allocation9 + $0x38] sm:$0xff] }
  0x62   :  { %1723 = vst [vmem:[#allocation27_spill] sm:$0xff] %v1339_v54  ;;  %795 = vmatpush3.xpose.msra.mxu0 %v1339_v54  ;;  %v1732_v30 = vmax.f32 %v1199_v13, 0.0  ;;  %v523_v24 = vmul.f32 %v1368_v48, %v1368_v48  ;;  %v537_v52 = vadd.f32 %v1264_v6, %v1256_v60  ;;  %v384_v61 = vmul.f32 %v1351_v20, %v1362_v51  ;;  %v96_v60 = vld [vmem:[#allocation6 + $0x60] sm:$0xff] }
  0x63   :  { %1730 = vst [vmem:[#allocation29_spill] sm:$0xff] %v1358_v35  ;;  %796 = vmatprep.subr.mxu0 %v1731_v53  ;;  %v301_v22 = vsel %vm1345_vm7, %v298_v47, %v295_v36  ;;  %v881_v55 = vpop.eup %880  ;;  %v1391_v0 = vadd.f32 %v385_v2, %v97_v12  ;;  %v1735_v6 = vmax.f32 %v1202_v18, 0.0  ;;  %896 = vpow2.f32 %v196_v8  ;;  %v95_v12 = vld [vmem:[#allocation6 + $0x58] sm:$0xff] }
  0x64   :  { %v1373_v16 = vadd.f32 %v319_v25, %v1732_v30  ;;  %v524_v3 = vmul.f32 %v1386_v1, %v1386_v1  ;;  %v883_v31 = vpop.eup %882  ;;  %v1737_v28 = vmax.f32 %v1204_v21, 0.0  ;;  %v212_v37 = vadd.f32 1.0, %v881_v55  ;;  %v1416_v25 = vld [vmem:[#allocation9 + $0x30] sm:$0xff] }
  0x65   :  { %1734 = vst [vmem:[#allocation31_spill] sm:$0xff] %v1391_v0  ;;  %v1395_v59 = vadd.f32 %v310_v23, %v1735_v6  ;;  %v215_v5 = vmul.f32 -0.5, %v881_v55  ;;  %v1408_v18 = vmul.f32 %v1397_v7, %v1397_v7  ;;  %v1410_v4 = vpop.eup %884  ;;  %v221_v21 = vadd.f32 1.0, %v883_v31  ;;  %v94_v6 = vld [vmem:[#allocation6 + $0x50] sm:$0xff] }
  0x66   :  { %1733 = vst [vmem:[#allocation30_spill] sm:$0xff] %v1373_v16  ;;  %797 = vmatpush3.xpose.msra.mxu0 %v1358_v35  ;;  %v1404_v56 = vadd.f32 %v301_v22, %v1737_v28  ;;  %v383_v17 = vmul.f32 %v1373_v16, %v1382_v62  ;;  %v224_v47 = vmul.f32 -0.5, %v883_v31  ;;  %v538_v2 = vadd.f32 %v537_v52, %v523_v24  ;;  %v887_v22 = vpop.eup %886  ;;  %v93_v28 = vld [vmem:[#allocation6 + $0x48] sm:$0xff] }
  0x67   :  { %1736 = vst [vmem:[#allocation32_spill] sm:$0xff] %v1395_v59  ;;  %798 = vmatprep.subr.mxu0 %v1731_v53  ;;  %v1420_v8 = vadd.f32 %v384_v61, %v96_v60  ;;  %v1424_v23 = vmul.f32 %v1414_v9, %v1414_v9  ;;  %v1428_v36 = vmul.f32 %v1416_v25, %v1416_v25  ;;  %898 = vlog2.f32 %v212_v37  ;;  %v1439_v60 = vpop.eup %888 }
  0x68   :  { %v1432_v30 = vmul.f32 %v1418_v49, %v1418_v49  ;;  %v382_v24 = vmul.f32 %v1395_v59, %v1212_v32  ;;  %v381_v52 = vmul.f32 %v1404_v56, %v1214_v33  ;;  %v218_v61 = vand.u32 2147483647, %v881_v55 }
  0x69   :  { %1738 = vst [vmem:[#allocation33_spill] sm:$0xff] %v1420_v8  ;;  %v216_v13 = vadd.f32 1.0, %v215_v5  ;;  %900 = vlog2.f32 %v221_v21  ;;  %v225_v42 = vadd.f32 1.0, %v224_v47  ;;  %v230_v10 = vadd.f32 1.0, %v1410_v4  ;;  %v891_v35 = vpop.eup %890 }
  0x6a   :  { %799 = vmatpush3.xpose.msra.mxu0 %v1391_v0  ;;  %v1445_v54 = vadd.f32 %v383_v17, %v95_v12  ;;  %v233_v32 = vmul.f32 -0.5, %v1410_v4  ;;  %v1450_v33 = vmul.f32 %v1442_v29, %v1442_v29  ;;  %v539_v37 = vadd.f32 %v538_v2, %v524_v3 }
  0x6b   :  { %800 = vmatprep.subr.mxu0 %v1731_v53  ;;  %v227_v0 = vand.u32 2147483647, %v883_v31  ;;  %902 = vlog2.f32 %v230_v10  ;;  %v239_v15 = vadd.f32 1.0, %v887_v22  ;;  %v242_v14 = vmul.f32 -0.5, %v887_v22  ;;  %v893_v12 = vpop.eup %892 }
  0x6c   :  { %1739 = vst [vmem:[#allocation34_spill] sm:$0xff] %v1445_v54  ;;  %v1453_v5 = vadd.f32 %v382_v24, %v94_v6  ;;  %v1455_v21 = vadd.f32 %v381_v52, %v93_v28  ;;  %v236_v17 = vand.u32 2147483647, %v1410_v4  ;;  %v248_v47 = vadd.f32 1.0, %v1439_v60 }
  0x6d   :  { %v1460_v58 = vmul.f32 %v881_v55, %v216_v13  ;;  %vm1462_vm8 = vcmp.lt.f32.partialorder %v218_v61, 0.0004427343  ;;  %v1466_v10 = vmul.f32 %v883_v31, %v225_v42  ;;  %904 = vlog2.f32 %v239_v15 }
  0x6e   :  { %801 = vmatpush3.xpose.msra.mxu0 %v1420_v8  ;;  %1740 = vst [vmem:[#allocation35_spill] sm:$0xff] %v1453_v5  ;;  %v251_v2 = vmul.f32 -0.5, %v1439_v60  ;;  %v895_v24 = vpop.eup %894  ;;  %v234_v52 = vadd.f32 1.0, %v233_v32  ;;  %v245_v6 = vand.u32 2147483647, %v887_v22  ;;  %906 = vlog2.f32 %v248_v47 }
  0x6f   :  { %802 = vmatprep.subr.mxu0 %v1731_v53  ;;  %v257_v28 = vadd.f32 1.0, %v891_v35  ;;  %vm1469_vm9 = vcmp.lt.f32.partialorder %v227_v0, 0.0004427343  ;;  %v243_v13 = vadd.f32 1.0, %v242_v14  ;;  %v254_v55 = vand.u32 2147483647, %v1439_v60 }
  0x70   :  { %v260_v61 = vmul.f32 -0.5, %v891_v35  ;;  %vm1475_vm10 = vcmp.lt.f32.partialorder %v236_v17, 0.0004427343  ;;  %v266_v15 = vadd.f32 1.0, %v893_v12  ;;  %v269_v31 = vmul.f32 -0.5, %v893_v12  ;;  %v897_v32 = vpop.eup %896 }
  0x71   :  { %908 = vlog2.f32 %v257_v28  ;;  %v252_v0 = vadd.f32 1.0, %v251_v2  ;;  %v263_v26 = vand.u32 2147483647, %v891_v35  ;;  %v275_v20 = vadd.f32 1.0, %v895_v24  ;;  %v88_v28 = vld [vmem:[#allocation6 + $0x20] sm:$0xff] }
  0x72   :  { %803 = vmatpush3.xpose.msra.mxu0 %v1445_v54  ;;  %v261_v47 = vadd.f32 1.0, %v260_v61  ;;  %v235_v14 = vmul.f32 %v1410_v4, %v234_v52  ;;  %vm1481_vm11 = vcmp.lt.f32.partialorder %v245_v6, 0.0004427343  ;;  %910 = vlog2.f32 %v266_v15 }
  0x73   :  { %804 = vmatprep.subr.mxu0 %v1731_v53  ;;  %v278_v17 = vmul.f32 -0.5, %v895_v24  ;;  %v244_v54 = vmul.f32 %v887_v22, %v243_v13  ;;  %vm1485_vm12 = vcmp.lt.f32.partialorder %v254_v55, 0.0004427343  ;;  %v272_v16 = vand.u32 2147483647, %v893_v12 }
  0x74   :  { %912 = vlog2.f32 %v275_v20  ;;  %v270_v2 = vadd.f32 1.0, %v269_v31  ;;  %v281_v61 = vand.u32 2147483647, %v895_v24  ;;  %v284_v27 = vadd.f32 1.0, %v897_v32  ;;  %v899_v4 = vpop.eup %898  ;;  %v1502_v20 = vld [vmem:[%s1681_s5] sm:$0x1] }
  0x75   :  { %v287_v59 = vmul.f32 -0.5, %v897_v32  ;;  %v253_v52 = vmul.f32 %v1439_v60, %v252_v0  ;;  %v1492_v6 = vmul.f32 %v891_v35, %v261_v47  ;;  %vm1494_vm13 = vcmp.lt.f32.partialorder %v263_v26, 0.0004427343 }
  0x76   :  { %805 = vmatpush3.xpose.msra.mxu0 %v1453_v5  ;;  %v540_v13 = vadd.f32 %v539_v37, %v1408_v18  ;;  %v901_v55 = vpop.eup %900  ;;  %v214_v15 = vmul.f32 0.6931472, %v899_v4  ;;  %v279_v31 = vadd.f32 1.0, %v278_v17  ;;  %914 = vlog2.f32 %v284_v27 }
  0x77   :  { %806 = vmatprep.subr.mxu0 %v1731_v53  ;;  %v288_v5 = vadd.f32 1.0, %v287_v59  ;;  %v223_v38 = vmul.f32 0.6931472, %v901_v55  ;;  %vm1504_vm14 = vcmp.lt.f32.partialorder %v272_v16, 0.0004427343  ;;  %v271_v37 = vmul.f32 %v893_v12, %v270_v2  ;;  %v84_v12 = vld [vmem:[#allocation6] sm:$0xff] }
  0x78   :  { %v290_v26 = vand.u32 2147483647, %v897_v32  ;;  %v541_v60 = vadd.f32 %v540_v13, %v1424_v23  ;;  %v903_v0 = vpop.eup %902  ;;  %v220_v18 = vsel %vm1462_vm8, %v1460_v58, %v214_v15  ;;  %vm1513_vm15 = vcmp.lt.f32.partialorder %v281_v61, 0.0004427343 }
  0x79   :  { %v567_v27 = vand.u32 2147483647, %v1502_v20  ;;  %v229_v16 = vsel %vm1469_vm9, %v1466_v10, %v223_v38  ;;  %v232_v59 = vmul.f32 0.6931472, %v903_v0  ;;  %v1757_v23 = vmax.f32 %v1216_v34, 0.0 }
  0x7a   :  { %807 = vmatpush3.xpose.msra.mxu0 %v1455_v21  ;;  %v542_v3 = vadd.f32 %v541_v60, %v1428_v36  ;;  %v905_v58 = vpop.eup %904  ;;  %v280_v2 = vmul.f32 %v895_v24, %v279_v31  ;;  %v1525_v61 = vmul.f32 %v897_v32, %v288_v5  ;;  %v1758_v4 = vmax.f32 %v1225_v39, 0.0  ;;  %v85_v36 = vld [vmem:[#allocation6 + $0x8] sm:$0xff]  ;;  %v86_v60 = vld [vmem:[#allocation6 + $0x10] sm:$0xff] }
  0x7b   :  { %808 = vmatprep.subr.mxu0 %v1731_v53  ;;  %v356_v17 = vadd.f32 %v220_v18, %v1757_v23  ;;  %v568_v55 = vsub.f32 0.0, %v567_v27  ;;  %v907_v15 = vpop.eup %906  ;;  %v238_v8 = vsel %vm1475_vm10, %v235_v14, %v232_v59  ;;  %v241_v38 = vmul.f32 0.6931472, %v905_v58  ;;  %v87_v59 = vld [vmem:[#allocation6 + $0x18] sm:$0xff] }
  0x7c   :  { %v357_v13 = vadd.f32 %v229_v16, %v1758_v4  ;;  %vm1531_vm0 = vcmp.lt.f32.partialorder %v290_v26, 0.0004427343  ;;  %v250_v24 = vmul.f32 0.6931472, %v907_v15  ;;  %v1761_v5 = vmax.f32 %v1227_v40, 0.0 }
  0x7d   :  { %v372_v34 = vmul.f32 %v356_v17, %v1244_v50  ;;  %916 = vlog2.f32 %v356_v17  ;;  %v247_v42 = vsel %vm1481_vm11, %v244_v54, %v241_v38  ;;  %v543_v26 = vadd.f32 %v542_v3, %v1432_v30 }
  0x7e   :  { %v358_v32 = vadd.f32 %v238_v8, %v1761_v5  ;;  %v373_v39 = vmul.f32 %v357_v13, %v1250_v57  ;;  %918 = vlog2.f32 %v357_v13  ;;  %v909_v31 = vpop.eup %908  ;;  %v569_v0 = vmul.f32 1.442695, %v568_v55  ;;  %v89_v55 = vld [vmem:[#allocation6 + $0x28] sm:$0xff] }
  0x7f   :  { %v1541_v14 = vadd.f32 %v372_v34, %v84_v12  ;;  %v256_v50 = vsel %vm1485_vm12, %v253_v52, %v250_v24  ;;  %v259_v18 = vmul.f32 0.6931472, %v909_v31  ;;  %v1762_v40 = vmax.f32 %v1229_v41, 0.0  ;;  %v911_v16 = vpop.eup %910 }
  0x80   :  { %v374_v57 = vmul.f32 %v358_v32, %v1368_v48  ;;  %v1763_v23 = vmax.f32 %v1236_v44, 0.0  ;;  %v1551_v54 = vadd.f32 %v373_v39, %v85_v36  ;;  %920 = vlog2.f32 %v358_v32  ;;  %v90_v36 = vld [vmem:[#allocation6 + $0x30] sm:$0xff]  ;;  %v91_v39 = vld [vmem:[#allocation6 + $0x38] sm:$0xff] }
  0x81   :  { %v359_v27 = vadd.f32 %v247_v42, %v1762_v40  ;;  %v416_v30 = vmul.f32 %v1541_v14, %v1541_v14  ;;  %v913_v17 = vpop.eup %912  ;;  %v265_v41 = vsel %vm1494_vm13, %v1492_v6, %v259_v18  ;;  %v268_v52 = vmul.f32 0.6931472, %v911_v16  ;;  %v92_v40 = vld [vmem:[#allocation6 + $0x40] sm:$0xff] }
  0x82   :  { %v360_v19 = vadd.f32 %v256_v50, %v1763_v23  ;;  %v1559_v3 = vadd.f32 %v374_v57, %v86_v60  ;;  %v277_v58 = vmul.f32 0.6931472, %v913_v17  ;;  %v1764_v44 = vmax.f32 %v1238_v45, 0.0 }
  0x83   :  { %v375_v48 = vmul.f32 %v359_v27, %v1386_v1  ;;  %v417_v13 = vmul.f32 %v1551_v54, %v1551_v54  ;;  %v274_v15 = vsel %vm1504_vm14, %v271_v37, %v268_v52  ;;  %922 = vlog2.f32 %v359_v27  ;;  %v915_v6 = vpop.eup %914 }
  0x84   :  { %v361_v12 = vadd.f32 %v265_v41, %v1764_v44  ;;  %v376_v4 = vmul.f32 %v360_v19, %v1397_v7  ;;  %v418_v1 = vmul.f32 %v1559_v3, %v1559_v3  ;;  %v283_v45 = vsel %vm1513_vm15, %v280_v2, %v277_v58  ;;  %v1770_v44 = vld [vmem:[#allocation26_spill] sm:$0xff] }
  0x85   :  { %v1568_v22 = vadd.f32 %v375_v48, %v87_v59  ;;  %v1765_v8 = vmax.f32 %v1240_v46, 0.0  ;;  %v286_v35 = vmul.f32 0.6931472, %v915_v6  ;;  %v1766_v37 = vmax.f32 %v1258_v63, 0.0 }
  0x86   :  { %v377_v38 = vmul.f32 %v361_v12, %v1414_v9  ;;  %v1577_v34 = vadd.f32 %v376_v4, %v88_v28  ;;  %v432_v32 = vadd.f32 %v417_v13, %v416_v30  ;;  %924 = vlog2.f32 %v360_v19  ;;  %v1771_v13 = vld [vmem:[#allocation30_spill] sm:$0xff] }
  0x87   :  { %v362_v7 = vadd.f32 %v274_v15, %v1765_v8  ;;  %v363_v24 = vadd.f32 %v283_v45, %v1766_v37  ;;  %v419_v5 = vmul.f32 %v1568_v22, %v1568_v22  ;;  %v292_v9 = vsel %vm1531_vm0, %v1525_v61, %v286_v35  ;;  %v1775_v37 = vld [vmem:[#allocation35_spill] sm:$0xff] }
  0x88   :  { %v1584_v2 = vadd.f32 %v377_v38, %v89_v55  ;;  %v420_v46 = vmul.f32 %v1577_v34, %v1577_v34  ;;  %v433_v31 = vadd.f32 %v432_v32, %v418_v1  ;;  %926 = vlog2.f32 %v361_v12  ;;  %v1772_v55 = vld [vmem:[#allocation23_spill] sm:$0xff]  ;;  %v1774_v38 = vld [vmem:[#allocation21_spill] sm:$0xff] }
  0x89   :  { %v378_v47 = vmul.f32 %v362_v7, %v1416_v25  ;;  %v379_v63 = vmul.f32 %v363_v24, %v1418_v49  ;;  %v1767_v60 = vmax.f32 %v1266_v11, 0.0  ;;  %928 = vlog2.f32 %v362_v7  ;;  %v1773_v7 = vld [vmem:[#allocation28_spill] sm:$0xff] }
  0x8a   :  { %v421_v25 = vmul.f32 %v1584_v2, %v1584_v2  ;;  %v917_v18 = vpop.eup %916  ;;  %v434_v57 = vadd.f32 %v433_v31, %v419_v5  ;;  %930 = vlog2.f32 %v363_v24  ;;  %v544_v10 = vadd.f32 %v543_v26, %v1450_v33 }
  0x8b   :  { %v364_v42 = vadd.f32 %v292_v9, %v1767_v60  ;;  %v394_v50 = vadd.f32 %v378_v47, %v90_v36  ;;  %v395_v27 = vadd.f32 %v379_v63, %v91_v39  ;;  %v919_v61 = vpop.eup %918  ;;  %v532_v49 = vmul.f32 %v1382_v62, %v1382_v62  ;;  %v1768_v62 = vld [vmem:[#allocation20_spill] sm:$0xff]  ;;  %v1777_v63 = vld [vmem:[#allocation34_spill] sm:$0xff] }
  0x8c   :  { %v435_v59 = vadd.f32 %v434_v57, %v420_v46  ;;  %v545_v23 = vadd.f32 %v544_v10, %v1234_v43  ;;  %v463_v30 = vmul.f32 0.6931472, %v917_v18  ;;  %v465_v17 = vmul.f32 0.6931472, %v919_v61  ;;  %v1779_v61 = vld [vmem:[#allocation33_spill] sm:$0xff] }
  0x8d   :  { %v380_v16 = vmul.f32 %v364_v42, %v1442_v29  ;;  %932 = vlog2.f32 %v364_v42  ;;  %v422_v11 = vmul.f32 %v394_v50, %v394_v50  ;;  %v921_v28 = vpop.eup %920  ;;  %v423_v41 = vmul.f32 %v395_v27, %v395_v27  ;;  %v1769_v29 = vld [vmem:[#allocation32_spill] sm:$0xff] }
  0x8e   :  { %934 = vpow2.f32 %v569_v0  ;;  %v436_v33 = vadd.f32 %v435_v59, %v421_v25  ;;  %v533_v26 = vmul.f32 %v1362_v51, %v1362_v51  ;;  %v546_v52 = vadd.f32 %v545_v23, %v1768_v62 }
  0x8f   :  { %936 = vlog2.f32 %v1404_v56  ;;  %v396_v19 = vadd.f32 %v380_v16, %v92_v40  ;;  %v467_v48 = vmul.f32 0.6931472, %v921_v28  ;;  %v494_v58 = vadd.f32 %v465_v17, %v463_v30 }
  0x90   :  { %938 = vlog2.f32 %v1769_v29  ;;  %v437_v0 = vadd.f32 %v436_v33, %v422_v11  ;;  %v534_v56 = vmul.f32 %v1770_v44, %v1770_v44  ;;  %v547_v12 = vadd.f32 %v546_v52, %v532_v49  ;;  %v923_v4 = vpop.eup %922  ;;  %v1782_v29 = vld [vmem:[#allocation29_spill] sm:$0xff] }
  0x91   :  { %809 = vmatpush3.xpose.msra.mxu0 %v396_v19  ;;  %v424_v43 = vmul.f32 %v396_v19, %v396_v19  ;;  %940 = vlog2.f32 %v1771_v13  ;;  %v535_v51 = vmul.f32 %v1772_v55, %v1772_v55  ;;  %v495_v15 = vadd.f32 %v494_v58, %v467_v48  ;;  %v1780_v19 = vld [vmem:[#allocation22_spill] sm:$0xff] }
  0x92   :  { %810 = vmatprep.subr.mxu0 %v1731_v53  ;;  %v425_v1 = vmul.f32 %v1455_v21, %v1455_v21  ;;  %v438_v6 = vadd.f32 %v437_v0, %v423_v41  ;;  %v548_v45 = vadd.f32 %v547_v12, %v533_v26  ;;  %v469_v8 = vmul.f32 0.6931472, %v923_v4  ;;  %v1776_v21 = vld [vmem:[#allocation25_spill] sm:$0xff] }
  0x93   :  { %942 = vlog2.f32 %v1773_v7  ;;  %v536_v36 = vmul.f32 %v1774_v38, %v1774_v38  ;;  %v925_v35 = vpop.eup %924  ;;  %v426_v24 = vmul.f32 %v1775_v37, %v1775_v37  ;;  %v427_v31 = vmul.f32 %v1777_v63, %v1777_v63 }
  0x94   :  { %v439_v5 = vadd.f32 %v438_v6, %v424_v43  ;;  %v549_v32 = vadd.f32 %v548_v45, %v534_v56  ;;  %v496_v39 = vadd.f32 %v495_v15, %v469_v8  ;;  %944 = vlog2.f32 %v1776_v21  ;;  %v1783_v56 = vld [vmem:[#allocation27_spill] sm:$0xff] }
  0x95   :  { %811 = vmatpush3.xpose.msra.mxu0 %v395_v27  ;;  %v927_v47 = vpop.eup %926  ;;  %v471_v46 = vmul.f32 0.6931472, %v925_v35  ;;  %v1778_v27 = vld [vmem:[#allocation24_spill] sm:$0xff]  ;;  %v428_v49 = vmul.f32 %v1779_v61, %v1779_v61  ;;  %v430_v48 = vmul.f32 %v1782_v29, %v1782_v29  ;;  %v431_v12 = vmul.f32 %v1783_v56, %v1783_v56 }
  0x96   :  { %812 = vmatprep.subr.mxu0 %v1731_v53  ;;  %v929_v9 = vpop.eup %928  ;;  %v440_v60 = vadd.f32 %v439_v5, %v425_v1  ;;  %v550_v42 = vadd.f32 %v549_v32, %v535_v51  ;;  %v473_v25 = vmul.f32 0.6931472, %v927_v47  ;;  %946 = vlog2.f32 %v1778_v27 }
  0x97   :  { %v931_v18 = vpop.eup %930  ;;  %v475_v40 = vmul.f32 0.6931472, %v929_v9  ;;  %v497_v57 = vadd.f32 %v496_v39, %v471_v46  ;;  %948 = vlog2.f32 %v1780_v19  ;;  %v566_v46 = vmax.f32 %v1502_v20, 0.0  ;;  %v581_v20 = vld [vmem:[%s1680_s4] sm:$0x1]  ;;  %s1112_s4 = smov [#allocation11]  }
  0x98   :  { %v551_v16 = vadd.f32 %v550_v42, %v536_v36  ;;  %v441_v11 = vadd.f32 %v440_v60, %v426_v24  ;;  %v477_v23 = vmul.f32 0.6931472, %v931_v18  ;;  %v564_v60 = vld [vmem:[%s1682_s6] sm:$0x1]  ;;  %vm591_vm2 = vcmask 1040384   ;;  %s739_s6 = sshll.u32 %s1112_s4, 4  ;;  %s740_s6 = int_to_ptr.vmem [resolvable:$true] %s739_s6 }
  0x99   :  { %813 = vmatpush3.xpose.msra.mxu0 %v394_v50  ;;  %v498_v30 = vadd.f32 %v497_v57, %v473_v25  ;;  %v1781_v50 = vld [vmem:[#allocation31_spill] sm:$0xff]  ;;  %s1034_s12 = scalar_lea.vmem %s740_s6, 128  ;;  %p1039_p7 = scmp.lt.s32.totalorder %s740_s6, %s740_s6 }
  0x9a   :  { %v933_v10 = vpop.eup %932  ;;  %814 = vmatprep.subr.mxu0 %v1731_v53  ;;  %552 = vadd.xlane.f32.xlu1 %v551_v16  ;;  %v429_v28 = vmul.f32 %v1781_v50, %v1781_v50  ;;  %v442_v41 = vadd.f32 %v441_v11, %v427_v31  ;;  %p1035_p6 = scmp.ne.s32.totalorder %s740_s6, %s1034_s12  ;;  %p1040_p8 = scmp.lt.s32.totalorder %s1034_s12, %s1034_s12 }
  0x9b   :  { %v935_v59 = vpop.eup %934  ;;  %v479_v26 = vmul.f32 0.6931472, %v933_v10  ;;  %v499_v62 = vadd.f32 %v498_v30, %v475_v40  ;;  %v647_v40 = vld [vmem:[#allocation3] sm:$0xff] }
  0x9c   :  { %v937_v17 = vpop.eup %936  ;;  %v571_v33 = vadd.f32 1.0, %v935_v59  ;;  %v443_v58 = vadd.f32 %v442_v41, %v428_v49  ;;  %v574_v15 = vmul.f32 -0.5, %v935_v59  ;;  %v577_v37 = vand.u32 2147483647, %v935_v59  ;;  %p1041_p9 = por %p1040_p8, %p1039_p7 }
  0x9d   :  { %815 = vmatpush3.xpose.msra.mxu0 %v1584_v2  ;;  %v939_v52 = vpop.eup %938  ;;  %v481_v43 = vmul.f32 0.6931472, %v937_v17  ;;  %v500_v0 = vadd.f32 %v499_v62, %v477_v23 }
  0x9e   :  { %950 = vlog2.f32 %v571_v33  ;;  %816 = vmatprep.subr.mxu0 %v1731_v53  ;;  %v941_v44 = vpop.eup %940  ;;  %v444_v4 = vadd.f32 %v443_v58, %v429_v28  ;;  %v483_v13 = vmul.f32 0.6931472, %v939_v52  ;;  %v575_v35 = vadd.f32 1.0, %v574_v15  ;;  %p1042_p10 = pnand %p1041_p9, %p1035_p6 }
  0x9f   :  { %v501_v55 = vadd.f32 %v500_v0, %v479_v26  ;;  %v485_v1 = vmul.f32 0.6931472, %v941_v44  ;;  %vm578_vm1 = vcmp.lt.f32.partialorder %v577_v37, 0.0004427343 }
  0xa0   :  { %v943_v2 = vpop.eup %942  ;;  %v445_v51 = vadd.f32 %v444_v4, %v430_v48  ;;  %v576_v47 = vmul.f32 %v935_v59, %v575_v35 }
  0xa1   :  { %817 = vmatpush3.xpose.msra.mxu0 %v1577_v34  ;;  %v502_v6 = vadd.f32 %v501_v55, %v481_v43  ;;  %v945_v45 = vpop.eup %944  ;;  %v487_v7 = vmul.f32 0.6931472, %v943_v2 }
  0xa2   :  { %818 = vmatprep.subr.mxu0 %v1731_v53  ;;  %v446_v8 = vadd.f32 %v445_v51, %v431_v12  ;;  %v489_v34 = vmul.f32 0.6931472, %v945_v45 }
  0xa3   :  { %v503_v38 = vadd.f32 %v502_v6, %v483_v13  ;;  %v947_v36 = vpop.eup %946 }
  0xa4   :  { %447 = vadd.xlane.f32.xlu0 %v446_v8  ;;  %v949_v5 = vpop.eup %948  ;;  %v491_v32 = vmul.f32 0.6931472, %v947_v36 }
  0xa5   :  { %819 = vmatpush3.xpose.msra.mxu0 %v1568_v22  ;;  %v504_v24 = vadd.f32 %v503_v38, %v485_v1  ;;  %v493_v22 = vmul.f32 0.6931472, %v949_v5 }
  0xa6   :  { %820 = vmatprep.subr.mxu0 %v1731_v53 }
  0xa7   :  { %v505_v39 = vadd.f32 %v504_v24, %v487_v7 }
  0xa9   :  { %821 = vmatpush3.xpose.msra.mxu0 %v1559_v3  ;;  %v506_v9 = vadd.f32 %v505_v39, %v489_v34 }
  0xaa   :  { %822 = vmatprep.subr.mxu0 %v1731_v53 }
  0xab   :  { %v951_v21 = vpop.eup %950  ;;  %v507_v31 = vadd.f32 %v506_v9, %v491_v32 }
  0xac   :  { %v573_v63 = vmul.f32 0.6931472, %v951_v21 }
  0xad   :  { %823 = vmatpush3.xpose.msra.mxu0 %v1551_v54  ;;  %v508_v25 = vadd.f32 %v507_v31, %v493_v22 }
  0xae   :  { %v579_v42 = vsel %vm578_vm1, %v576_v47, %v573_v63  ;;  %824 = vmatprep.subr.mxu0 %v1731_v53  ;;  %v625_v53 = vmul.f32 %v564_v60, %v564_v60  ;;  %v726_v47 = vlaneseq }
  0xaf   :  { %v580_v3 = vadd.f32 %v579_v42, %v566_v46  ;;  %509 = vadd.xlane.f32.xlu0 %v508_v25 }
  0xb0   :  { %v626_v10 = vsel %vm591_vm2, %v625_v53, 0.0  ;;  %v727_v21 = vshrl.u32 %v726_v47, 7 }
  0xb1   :  { %v582_v18 = vmul.f32 %v580_v3, %v564_v60  ;;  %952 = vlog2.f32 %v580_v3  ;;  %825 = vmatpush3.xpose.msra.mxu0 %v1541_v14 }
  0xb2   :  { %v728_v46 = vsub.s32 0, %v727_v21 }
  0xb3   :  { %v1652_v54 = vadd.f32 %v582_v18, %v581_v20 }
  0xb4   :  { %827 = vmatmul.mubr.f32.vlgmr.msra.gmra.mxu0 %v647_v40 }
  0xb5   :  { %v590_v27 = vmul.f32 %v1652_v54, %v1652_v54  ;;  %v729_v22 = vrot.slane %v1652_v54, %v728_v46 }
  0xb7   :  { %v592_v57 = vsel %vm591_vm2, %v590_v27, 0.0 }
  0xb8   :  { %593 = vadd.xlane.f32.xlu1 %v592_v57 }
  0xbc   :  { %627 = vadd.xlane.f32.xlu1 %v626_v10 }
  0xbe   :  { %v953_v61 = vpop.eup %952 }
  0xbf   :  { %v611_v49 = vmul.f32 0.6931472, %v953_v61 }
  0xc1   :  { %v612_v16 = vsel %vm591_vm2, %v611_v49, 0.0 }
  0xc2   :  { %613 = vadd.xlane.f32.xlu0 %v612_v16 }
 0x123   :  { %v553_v11 = vpop.xlane.xlu1 %552 }
 0x124   :  { %v554_v23 = vrot.slane %v553_v11, 4 }
 0x126   :  { %v555_v17 = vadd.f32 %v554_v23, %v553_v11 }
 0x128   :  { %v556_v41 = vrot.slane %v555_v17, 2 }
 0x12a   :  { %v557_v29 = vadd.f32 %v556_v41, %v555_v17 }
 0x12c   :  { %v558_v44 = vrot.slane %v557_v29, 1 }
 0x12d   :  { %v448_v59 = vpop.xlane.xlu0 %447 }
 0x12e   :  { %v449_v14 = vrot.slane %v448_v59, 4  ;;  %v559_v51 = vadd.f32 %v558_v44, %v557_v29 }
 0x130   :  { %v450_v19 = vadd.f32 %v449_v14, %v448_v59 }
 0x132   :  { %v451_v30 = vrot.slane %v450_v19, 2 }
 0x134   :  { %v452_v50 = vadd.f32 %v451_v30, %v450_v19 }
 0x136   :  { %v453_v28 = vrot.slane %v452_v50, 1 }
 0x138   :  { %v510_v33 = vpop.xlane.xlu0 %509  ;;  %v454_v26 = vadd.f32 %v453_v28, %v452_v50 }
 0x139   :  { %v511_v62 = vrot.slane %v510_v33, 4 }
 0x13a   :  { %829 = vpush %v454_v26 }
 0x13b   :  { %v512_v52 = vadd.f32 %v511_v62, %v510_v33 }
 0x13d   :  { %v513_v48 = vrot.slane %v512_v52, 2 }
 0x13f   :  { %v514_v43 = vadd.f32 %v513_v48, %v512_v52 }
 0x141   :  { %v594_v58 = vpop.xlane.xlu1 %593  ;;  %v515_v56 = vrot.slane %v514_v43, 1 }
 0x142   :  { %v595_v0 = vrot.slane %v594_v58, 4 }
 0x143   :  { %v516_v13 = vadd.f32 %v515_v56, %v514_v43 }
 0x144   :  { %v596_v12 = vadd.f32 %v595_v0, %v594_v58 }
 0x145   :  { %v628_v4 = vpop.xlane.xlu1 %627  ;;  %831 = vpush %v516_v13 }
 0x146   :  { %v597_v55 = vrot.slane %v596_v12, 2  ;;  %v629_v2 = vrot.slane %v628_v4, 4  ;;  %833 = vpush %v559_v51 }
 0x148   :  { %v630_v15 = vadd.f32 %v629_v2, %v628_v4  ;;  %v598_v1 = vadd.f32 %v597_v55, %v596_v12 }
 0x14a   :  { %v599_v6 = vrot.slane %v598_v1, 1  ;;  %v631_v45 = vrot.slane %v630_v15, 2 }
 0x14b   :  { %v614_v8 = vpop.xlane.xlu0 %613 }
 0x14c   :  { %v615_v7 = vrot.slane %v614_v8, 4  ;;  %v600_v38 = vadd.f32 %v599_v6, %v598_v1  ;;  %v632_v35 = vadd.f32 %v631_v45, %v630_v15 }
 0x14e   :  { %v616_v36 = vadd.f32 %v615_v7, %v614_v8  ;;  %835 = vpush %v600_v38  ;;  %v633_v24 = vrot.slane %v632_v35, 1 }
 0x150   :  { %v617_v37 = vrot.slane %v616_v36, 2  ;;  %v634_v39 = vadd.f32 %v633_v24, %v632_v35 }
 0x152   :  { %v618_v34 = vadd.f32 %v617_v37, %v616_v36 }
 0x154   :  { %v619_v5 = vrot.slane %v618_v34, 1 }
 0x156   :  { %v620_v32 = vadd.f32 %v619_v5, %v618_v34 }
 0x158   :  { %837 = vpush %v620_v32 }
 0x159   :  { %839 = vpush %v634_v39 }
 0x16b   :  { %s830_s11 = spop %829 }
 0x174   :  { %v715_v9 = vpop.f32.mrf.mxu0 }
 0x175   :  { %v731_v63 = vadd.f32 %v729_v22, %v715_v9 }
 0x176   :  { %v828_v31 = vpop.f32.mrf.mxu0 }
 0x177   :  { %732 = vst [vmem:[#allocation11] sm:$0xff] %v731_v63 }
 0x178   :  { %1045 = shalt.err (!%p1042_p10)
}
 0x179   :  { %742 = dma.vmem_to_hbm [thread:$0]  %s740_s6, 128, %s1683_s7, [#allocation5]   ;;  %vm606_vm3 = vcmask 0   ;;  %v456_v25 = vstv %s830_s11 }
 0x17a   :  { %s1660_s15 = spop %831  ;;  %v457_v20 = vmul.f32 0.5, %v456_v25  ;;  %s1113_s20 = smov [#allocation12]  }
 0x17b   :  { %s1662_s16 = spop %833  ;;  %s749_s7 = sshll.u32 %s1113_s20, 4  ;;  %v518_v49 = vstv %s1660_s15  ;;  %s750_s7 = int_to_ptr.vmem [resolvable:$true] %s749_s7 }
 0x17c   :  { %v459_v40 = vsub.f32 -470.49652, %v457_v20  ;;  %v561_v16 = vstv %s1662_s16  ;;  %s1054_s21 = scalar_lea.vmem %s750_s7, 16  ;;  %s1058_s22 = scalar_lea.vmem %s750_s7, 32 }
 0x17d   :  { %p1055_p11 = scmp.ne.s32.totalorder %s750_s7, %s1054_s21  ;;  %p1059_p12 = scmp.lt.s32.totalorder %s750_s7, %s750_s7 }
 0x17e   :  { %p1060_p13 = scmp.lt.s32.totalorder %s1058_s22, %s1054_s21 }
 0x17f   :  { %s836_s17 = spop %835 }
 0x180   :  { %v602_v60 = vstv %s836_s17  ;;  %p1061_p0 = por %p1060_p13, %p1059_p12 }
 0x181   :  { %v603_v42 = vmul.f32 0.5, %v602_v60 }
 0x182   :  { %p1062_p1 = pnand %p1061_p0, %p1055_p11 }
 0x183   :  { %v605_v3 = vsub.f32 -14.703016, %v603_v42 }
 0x185   :  { %607 = vst.msk [vmem:[#allocation12] sm:$0x1] %vm606_vm3, %v605_v3 }
 0x189   :  { %s838_s18 = spop %837 }
 0x18a   :  { %v622_v18 = vstv %s838_s18  ;;  %s840_s19 = spop %839 }
 0x18b   :  { %v624_v54 = vsub.f32 -14.703016, %v622_v18  ;;  %v636_v27 = vstv %s840_s19 }
 0x18c   :  { %v637_v53 = vmul.f32 0.5, %v636_v27  ;;  %v640_v57 = vld [vmem:[#allocation12] sm:$0x1] }
 0x18d   :  { %v641_v10 = vadd.f32 %v640_v57, %v459_v40 }
 0x18e   :  { %v638_v61 = vsub.f32 %v624_v54, %v637_v53 }
 0x18f   :  { %643 = vst.msk [vmem:[#allocation12] sm:$0x1] %vm606_vm3, %v641_v10 }
 0x190   :  { %639 = vst.msk [vmem:[#allocation14] sm:$0x1] %vm606_vm3, %v638_v61 }
 0x191   :  { %1065 = shalt.err (!%p1062_p1)
}
 0x192   :  { %752 = dma.vmem_to_hbm [thread:$0]  %s750_s7, 16, %s1684_s8, [#allocation13]   ;;  %v520_v11 = vsub.f32 -470.49652, %v518_v49  ;;  %v562_v59 = vmul.f32 0.5, %v561_v16 }
 0x193   :  { %s1114_s24 = smov [#allocation14]  }
 0x194   :  { %s759_s25 = sshll.u32 %s1114_s24, 4  ;;  %v563_v14 = vsub.f32 %v520_v11, %v562_v59  ;;  %s760_s25 = int_to_ptr.vmem [resolvable:$true] %s759_s25 }
 0x195   :  { %s1074_s26 = scalar_lea.vmem %s760_s25, 16  ;;  %s1078_s27 = scalar_lea.vmem %s760_s25, 32 }
 0x196   :  { %p1075_p2 = scmp.ne.s32.totalorder %s760_s25, %s1074_s26  ;;  %p1079_p3 = scmp.lt.s32.totalorder %s760_s25, %s760_s25 }
 0x197   :  { %v644_v23 = vld [vmem:[#allocation14] sm:$0x1]  ;;  %p1080_p4 = scmp.lt.s32.totalorder %s1078_s27, %s1074_s26 }
 0x198   :  { %v645_v19 = vadd.f32 %v644_v23, %v563_v14 }
 0x199   :  { %p1081_p5 = por %p1080_p4, %p1079_p3 }
 0x19a   :  { %646 = vst.msk [vmem:[#allocation14] sm:$0x1] %vm606_vm3, %v645_v19 }
 0x19b   :  { %p1082_p6 = pnand %p1081_p5, %p1075_p2 }
 0x19d   :  { %1085 = shalt.err (!%p1082_p6)
}
 0x19e   :  { %762 = dma.vmem_to_hbm [thread:$0]  %s760_s25, 16, %s1685_s9, [#allocation13]  }
 0x19f   :  { %1100 = dma.done.wait [#allocation5], 128  }
 0x1a0   :  { %1101 = vsyncadd [#allocation5], 4294967168 }
 0x1a1   :  { %1102 = dma.done.wait [#allocation13], 32  }
 0x1a2   :  { %1103 = vsyncadd [#allocation13], 4294967264 }
 0x1a3   :  { %772 = vsyncpa [#allocation4], 1 }
 0x1a4   :  { %773 = vsyncpa [#allocation7], 1 }
 0x1a5   :  { %774 = vsyncpa [#allocation10], 1 }
 0x1a6   :  { %775 = vsyncpa [#allocation5], 1 }
 0x1a7   :  { %776 = vsyncpa [#allocation13], 1 }

</bundles_post_ra>
